<compile_context>
chip_gen: v7x
topology: tpu7x:2x2x1
jax: 0.10.0
libtpu: 0.0.40
codegen_flags: <defaults>
</compile_context>

<pallas_src>
import jax
import jax.numpy as jnp
import numpy as np
from jax import lax
from jax.experimental import pallas as pl
from jax.experimental.pallas import tpu as pltpu

NUM_CLASSES = 10


# ----------------------------- Pallas kernel -------------------------------

def _lenet_kernel(x_ref, w1e_ref, w1o_ref, b1_ref,
                  w2e_ref, w2o_ref, b2_ref,
                  esel_ref, w3_ref, b3_ref,
                  w4_ref, b4_ref, w5_ref, b5_ref,
                  out_ref, s1_ref, a1_ref, s2_ref):
    f32 = jnp.float32
    bf16 = jnp.bfloat16

    # ---- conv1: 5 banded matmuls (one per kernel row dy).  Even / odd output
    # columns are produced separately so pool1's W direction is a single max.
    acc_e = jnp.zeros((28, 112), f32)
    acc_o = jnp.zeros((28, 112), f32)
    for dy in range(5):
        slab = x_ref[dy:dy + 28, :]                                   # (28, 96) bf16
        acc_e = acc_e + jnp.dot(slab, w1e_ref[dy], preferred_element_type=f32)
        acc_o = acc_o + jnp.dot(slab, w1o_ref[dy], preferred_element_type=f32)
    conv1 = jnp.maximum(acc_e, acc_o) + b1_ref[...]                   # (28, 112)

    s1_ref[...] = jnp.zeros((32, 112), f32)
    s1_ref[0:28, :] = conv1
    # pool1 H direction + ReLU (valid results live on even rows).
    pool1 = jnp.maximum(jnp.maximum(s1_ref[0:28, :], s1_ref[1:29, :]), 0.0)
    a1_ref[...] = jnp.zeros((32, 112), f32)
    a1_ref[0:28, :] = pool1

    # ---- conv2: reads un-compacted pool1 rows (row stride 2 folded into the
    # slab offsets 2*dy); even / odd output columns split for pool2's W max.
    acc2_e = jnp.zeros((20, 80), f32)
    acc2_o = jnp.zeros((20, 80), f32)
    for dy in range(5):
        slab = a1_ref[2 * dy:2 * dy + 20, :].astype(bf16)             # (20, 112)
        acc2_e = acc2_e + jnp.dot(slab, w2e_ref[dy], preferred_element_type=f32)
        acc2_o = acc2_o + jnp.dot(slab, w2o_ref[dy], preferred_element_type=f32)
    conv2 = jnp.maximum(acc2_e, acc2_o) + b2_ref[...]                 # (20, 80)

    s2_ref[...] = jnp.zeros((32, 80), f32)
    s2_ref[0:20, :] = conv2
    # pool2 H direction + ReLU (valid results live on rows 0, 4, 8, 12, 16).
    pool2 = jnp.maximum(jnp.maximum(s2_ref[0:20, :], s2_ref[2:22, :]), 0.0)
    p2 = pool2.astype(bf16)                                           # (20, 80)

    # ---- fc1: pool2 row-gather + NCHW flatten folded into packed weights.
    y1 = b3_ref[...]                                                  # (1, 128)
    for i2 in range(5):
        g = jnp.dot(esel_ref[i2], p2, preferred_element_type=f32)     # (1, 80)
        y1 = y1 + jnp.dot(g.astype(bf16), w3_ref[i2],
                          preferred_element_type=f32)
    y1 = jnp.maximum(y1, 0.0)

    # ---- fc2 / fc3 (lane-padded to 128).
    y2 = jnp.maximum(
        jnp.dot(y1.astype(bf16), w4_ref[...], preferred_element_type=f32)
        + b4_ref[...], 0.0)
    y3 = (jnp.dot(y2.astype(bf16), w5_ref[...], preferred_element_type=f32)
          + b5_ref[...])
    out_ref[...] = y3


# --------------------- one-time host-side weight packing --------------------

def pack_params(params):
    """Fold im2col, pooling lane-compaction and the NCHW flatten into the
    weights (done once, outside the forward pass)."""
    w1 = np.asarray(params["w1"], np.float32)   # (5,5,3,6)  HWIO
    b1 = np.asarray(params["b1"], np.float32)
    w2 = np.asarray(params["w2"], np.float32)   # (5,5,6,16) HWIO
    b2 = np.asarray(params["b2"], np.float32)
    w3 = np.asarray(params["w3"], np.float32)   # (400,120), rows = c*25+i*5+j
    b3 = np.asarray(params["b3"], np.float32)
    w4 = np.asarray(params["w4"], np.float32)   # (120,84)
    b4 = np.asarray(params["b4"], np.float32)
    w5 = np.asarray(params["w5"], np.float32)   # (84,nc)
    b5 = np.asarray(params["b5"], np.float32)
    nc = w5.shape[1]

    # conv1 banded weights: input lanes = w_in*3 + c, output lanes = j*8 + o
    # (even split: w_out = 2j, odd split: w_out = 2j+1).
    w1e = np.zeros((5, 96, 112), np.float32)
    w1o = np.zeros((5, 96, 112), np.float32)
    for dy in range(5):
        for j in range(14):
            for dx in range(5):
                w1e[dy, (2 * j + dx) * 3:(2 * j + dx) * 3 + 3,
                    j * 8:j * 8 + 6] = w1[dy, dx]
                w1o[dy, (2 * j + 1 + dx) * 3:(2 * j + 1 + dx) * 3 + 3,
                    j * 8:j * 8 + 6] = w1[dy, dx]
    b1l = np.zeros((1, 112), np.float32)
    for j in range(14):
        b1l[0, j * 8:j * 8 + 6] = b1

    # conv2 banded weights: input lanes = j1*8 + c, output lanes = j2*16 + o2.
    w2e = np.zeros((5, 112, 80), np.float32)
    w2o = np.zeros((5, 112, 80), np.float32)
    for dy in range(5):
        for j2 in range(5):
            for dx in range(5):
                w2e[dy, (2 * j2 + dx) * 8:(2 * j2 + dx) * 8 + 6,
                    j2 * 16:j2 * 16 + 16] = w2[dy, dx]
                w2o[dy, (2 * j2 + 1 + dx) * 8:(2 * j2 + 1 + dx) * 8 + 6,
                    j2 * 16:j2 * 16 + 16] = w2[dy, dx]
    b2l = np.zeros((1, 80), np.float32)
    for j2 in range(5):
        b2l[0, j2 * 16:j2 * 16 + 16] = b2

    # constant row-selection matrices (pool2 output row i2 lives at row 4*i2).
    esel = np.zeros((5, 1, 20), np.float32)
    for i2 in range(5):
        esel[i2, 0, 4 * i2] = 1.0

    # fc1 weights with the NCHW (channel-major) flatten folded in.
    w3p = np.zeros((5, 80, 128), np.float32)
    for i2 in range(5):
        for j2 in range(5):
            for o2 in range(16):
                w3p[i2, j2 * 16 + o2, :120] = w3[o2 * 25 + i2 * 5 + j2, :]
    b3l = np.zeros((1, 128), np.float32); b3l[0, :120] = b3

    w4p = np.zeros((128, 128), np.float32); w4p[:120, :84] = w4
    b4l = np.zeros((1, 128), np.float32); b4l[0, :84] = b4
    w5p = np.zeros((128, 128), np.float32); w5p[:84, :nc] = w5
    b5l = np.zeros((1, 128), np.float32); b5l[0, :nc] = b5

    bf = jnp.bfloat16
    return (jnp.asarray(w1e, bf), jnp.asarray(w1o, bf), jnp.asarray(b1l),
            jnp.asarray(w2e, bf), jnp.asarray(w2o, bf), jnp.asarray(b2l),
            jnp.asarray(esel, bf), jnp.asarray(w3p, bf), jnp.asarray(b3l),
            jnp.asarray(w4p, bf), jnp.asarray(b4l),
            jnp.asarray(w5p, bf), jnp.asarray(b5l))


# ------------------------------ forward pass --------------------------------

def lenet_forward(packed, x_nchw, num_classes=NUM_CLASSES):
    B = x_nchw.shape[0]
    assert x_nchw.shape[1:] == (3, 32, 32), x_nchw.shape
    # NCHW -> packed-lane layout (B, H, W*C), c fastest.  One tiny XLA op.
    x0 = jnp.transpose(x_nchw, (0, 2, 3, 1)).reshape(B, 32, 96)
    x0 = x0.astype(jnp.bfloat16)

    (w1e, w1o, b1, w2e, w2o, b2, esel, w3p, b3, w4p, b4, w5p, b5) = packed

    def full(a):
        return pl.BlockSpec(a.shape, lambda i, _n=a.ndim: (0,) * _n)

    out = pl.pallas_call(
        _lenet_kernel,
        out_shape=jax.ShapeDtypeStruct((B, 1, 128), jnp.float32),
        grid=(B,),
        in_specs=[
            pl.BlockSpec((None, 32, 96), lambda i: (i, 0, 0)),   # x (per image)
            full(w1e), full(w1o), full(b1),
            full(w2e), full(w2o), full(b2),
            full(esel), full(w3p), full(b3),
            full(w4p), full(b4), full(w5p), full(b5),
        ],
        out_specs=pl.BlockSpec((None, 1, 128), lambda i: (i, 0, 0)),
        scratch_shapes=[
            pltpu.VMEM((32, 112), jnp.float32),   # conv1 output
            pltpu.VMEM((32, 112), jnp.float32),   # pool1 output
            pltpu.VMEM((32, 80), jnp.float32),    # conv2 output
        ],
        compiler_params=pltpu.CompilerParams(
            dimension_semantics=("parallel",)),
    )(x0, w1e, w1o, b1, w2e, w2o, b2, esel, w3p, b3, w4p, b4, w5p, b5)

    return out.reshape(B, 128)[:, :num_classes]


# ------------------------- reference (pure JAX) ------------------------------

def lenet_reference(params, x_nchw):
    x = jnp.transpose(x_nchw, (0, 2, 3, 1))
    dn = ("NHWC", "HWIO", "NHWC")

    def pool_relu(y):
        y = lax.reduce_window(y, -jnp.inf, lax.max, (1, 2, 2, 1), (1, 2, 2, 1),
                              "VALID")
        return jnp.maximum(y, 0.0)

    x = lax.conv_general_dilated(x, params["w1"], (1, 1), "VALID",
                                 dimension_numbers=dn) + params["b1"]
    x = pool_relu(x)
    x = lax.conv_general_dilated(x, params["w2"], (1, 1), "VALID",
                                 dimension_numbers=dn) + params["b2"]
    x = pool_relu(x)
    x = jnp.transpose(x, (0, 3, 1, 2)).reshape(x.shape[0], -1)
    x = jnp.maximum(x @ params["w3"] + params["b3"], 0.0)
    x = jnp.maximum(x @ params["w4"] + params["b4"], 0.0)
    x = x @ params["w5"] + params["b5"]
    return x


# ------------------------------ params ---------------------------------------

def init_params(key, num_classes=NUM_CLASSES, input_channels=3):
    ks = jax.random.split(key, 10)
    s = 0.05
    return {
        # conv weights stored HWIO (k, k, Cin, Cout)
        "w1": s * jax.random.normal(ks[0], (5, 5, input_channels, 6), jnp.float32),
        "b1": s * jax.random.normal(ks[1], (6,), jnp.float32),
        "w2": s * jax.random.normal(ks[2], (5, 5, 6, 16), jnp.float32),
        "b2": s * jax.random.normal(ks[3], (16,), jnp.float32),
        "w3": s * jax.random.normal(ks[4], (16 * 5 * 5, 120), jnp.float32),
        "b3": s * jax.random.normal(ks[5], (120,), jnp.float32),
        "w4": s * jax.random.normal(ks[6], (120, 84), jnp.float32),
        "b4": s * jax.random.normal(ks[7], (84,), jnp.float32),
        "w5": s * jax.random.normal(ks[8], (84, num_classes), jnp.float32),
        "b5": s * jax.random.normal(ks[9], (num_classes,), jnp.float32),
    }


# -------------------------------- main ---------------------------------------

if __name__ == "__main__":
    key = jax.random.PRNGKey(0)
    kx, kp = jax.random.split(key)
    # LeNet's fc1 (16*5*5) forces 32x32 spatial input; keep batch small.
    x = jax.random.normal(kx, (2, 3, 32, 32), jnp.float32)   # NCHW like PyTorch
    params = init_params(kp)
    packed = pack_params(params)                             # one-time packing

    fwd = jax.jit(lenet_forward)
    out = jax.block_until_ready(fwd(packed, x))
    assert out.shape == (2, NUM_CLASSES), out.shape

    ref = jax.block_until_ready(lenet_reference(params, x))
    err = float(jnp.max(jnp.abs(out - ref)))
    # bf16 matmul inputs with f32 accumulation -> expected error ~1e-3.
    assert err < 2e-2, err

    print("KERNEL_OK")
</pallas_src>

<mosaic_0001>
module attributes {stable_mosaic.version = 11 : i64} {
  func.func @_lenet_kernel(%arg0: i32, %arg1: memref<1x32x96xbf16, #tpu.memory_space<vmem>>, %arg2: memref<5x96x112xbf16, #tpu.memory_space<vmem>>, %arg3: memref<5x96x112xbf16, #tpu.memory_space<vmem>>, %arg4: memref<1x112xf32, #tpu.memory_space<vmem>>, %arg5: memref<5x112x80xbf16, #tpu.memory_space<vmem>>, %arg6: memref<5x112x80xbf16, #tpu.memory_space<vmem>>, %arg7: memref<1x80xf32, #tpu.memory_space<vmem>>, %arg8: memref<5x1x20xbf16, #tpu.memory_space<vmem>>, %arg9: memref<5x80x128xbf16, #tpu.memory_space<vmem>>, %arg10: memref<1x128xf32, #tpu.memory_space<vmem>>, %arg11: memref<128x128xbf16, #tpu.memory_space<vmem>>, %arg12: memref<1x128xf32, #tpu.memory_space<vmem>>, %arg13: memref<128x128xbf16, #tpu.memory_space<vmem>>, %arg14: memref<1x128xf32, #tpu.memory_space<vmem>>, %arg15: memref<1x1x128xf32, #tpu.memory_space<vmem>>, %arg16: memref<32x112xf32, #tpu.memory_space<vmem>>, %arg17: memref<32x112xf32, #tpu.memory_space<vmem>>, %arg18: memref<32x80xf32, #tpu.memory_space<vmem>>) attributes {dimension_semantics = [#tpu.dimension_semantics<parallel>], iteration_bounds = array<i64: 2>, scalar_prefetch = 0 : i64, scratch_operands = 3 : i64, tpu.core_type = #tpu.core_type<tc>, window_params = [{transform_indices = @transform_0, window_bounds = array<i64: 1, 32, 96>}, {pipeline_mode = #tpu.pipeline_mode<synchronous>, transform_indices = @transform_1, window_bounds = array<i64: 5, 96, 112>}, {pipeline_mode = #tpu.pipeline_mode<synchronous>, transform_indices = @transform_2, window_bounds = array<i64: 5, 96, 112>}, {pipeline_mode = #tpu.pipeline_mode<synchronous>, transform_indices = @transform_3, window_bounds = array<i64: 1, 112>}, {pipeline_mode = #tpu.pipeline_mode<synchronous>, transform_indices = @transform_4, window_bounds = array<i64: 5, 112, 80>}, {pipeline_mode = #tpu.pipeline_mode<synchronous>, transform_indices = @transform_5, window_bounds = array<i64: 5, 112, 80>}, {pipeline_mode = #tpu.pipeline_mode<synchronous>, transform_indices = @transform_6, window_bounds = array<i64: 1, 80>}, {pipeline_mode = #tpu.pipeline_mode<synchronous>, transform_indices = @transform_7, window_bounds = array<i64: 5, 1, 20>}, {pipeline_mode = #tpu.pipeline_mode<synchronous>, transform_indices = @transform_8, window_bounds = array<i64: 5, 80, 128>}, {pipeline_mode = #tpu.pipeline_mode<synchronous>, transform_indices = @transform_9, window_bounds = array<i64: 1, 128>}, {pipeline_mode = #tpu.pipeline_mode<synchronous>, transform_indices = @transform_10, window_bounds = array<i64: 128, 128>}, {pipeline_mode = #tpu.pipeline_mode<synchronous>, transform_indices = @transform_11, window_bounds = array<i64: 1, 128>}, {pipeline_mode = #tpu.pipeline_mode<synchronous>, transform_indices = @transform_12, window_bounds = array<i64: 128, 128>}, {pipeline_mode = #tpu.pipeline_mode<synchronous>, transform_indices = @transform_13, window_bounds = array<i64: 1, 128>}, {transform_indices = @transform_14, window_bounds = array<i64: 1, 1, 128>}]} {
    %cst = arith.constant 0.000000e+00 : f32
    %0 = vector.broadcast %cst : f32 to vector<28x112xf32>
    %cst_0 = arith.constant 0.000000e+00 : f32
    %1 = vector.broadcast %cst_0 : f32 to vector<28x112xf32>
    %c0 = arith.constant 0 : index
    %c0_1 = arith.constant 0 : index
    %c0_2 = arith.constant 0 : index
    %2 = vector.load %arg1[%c0, %c0_1, %c0_2] : memref<1x32x96xbf16, #tpu.memory_space<vmem>>, vector<1x28x96xbf16>
    %3 = vector.shape_cast %2 : vector<1x28x96xbf16> to vector<28x96xbf16>
    %c0_3 = arith.constant 0 : index
    %c0_4 = arith.constant 0 : index
    %c0_5 = arith.constant 0 : index
    %4 = vector.load %arg2[%c0_3, %c0_4, %c0_5] : memref<5x96x112xbf16, #tpu.memory_space<vmem>>, vector<1x96x112xbf16>
    %5 = vector.shape_cast %4 : vector<1x96x112xbf16> to vector<96x112xbf16>
    %cst_6 = arith.constant dense<0.000000e+00> : vector<28x112xf32>
    %6 = tpu.matmul %3, %5, %cst_6 {dimension_numbers = #tpu.dot_dimension_numbers<[1], [0], [0], [1], [0, 0, 1, 1], [], []>} : vector<28x96xbf16>, vector<96x112xbf16>, vector<28x112xf32> -> vector<28x112xf32>
    %7 = arith.addf %0, %6 : vector<28x112xf32>
    %c0_7 = arith.constant 0 : index
    %c0_8 = arith.constant 0 : index
    %c0_9 = arith.constant 0 : index
    %8 = vector.load %arg3[%c0_7, %c0_8, %c0_9] : memref<5x96x112xbf16, #tpu.memory_space<vmem>>, vector<1x96x112xbf16>
    %9 = vector.shape_cast %8 : vector<1x96x112xbf16> to vector<96x112xbf16>
    %cst_10 = arith.constant dense<0.000000e+00> : vector<28x112xf32>
    %10 = tpu.matmul %3, %9, %cst_10 {dimension_numbers = #tpu.dot_dimension_numbers<[1], [0], [0], [1], [0, 0, 1, 1], [], []>} : vector<28x96xbf16>, vector<96x112xbf16>, vector<28x112xf32> -> vector<28x112xf32>
    %11 = arith.addf %1, %10 : vector<28x112xf32>
    %c0_11 = arith.constant 0 : index
    %c1 = arith.constant 1 : index
    %c0_12 = arith.constant 0 : index
    %12 = vector.load %arg1[%c0_11, %c1, %c0_12] : memref<1x32x96xbf16, #tpu.memory_space<vmem>>, vector<1x28x96xbf16>
    %13 = vector.shape_cast %12 : vector<1x28x96xbf16> to vector<28x96xbf16>
    %c1_13 = arith.constant 1 : index
    %c0_14 = arith.constant 0 : index
    %c0_15 = arith.constant 0 : index
    %14 = vector.load %arg2[%c1_13, %c0_14, %c0_15] : memref<5x96x112xbf16, #tpu.memory_space<vmem>>, vector<1x96x112xbf16>
    %15 = vector.shape_cast %14 : vector<1x96x112xbf16> to vector<96x112xbf16>
    %cst_16 = arith.constant dense<0.000000e+00> : vector<28x112xf32>
    %16 = tpu.matmul %13, %15, %cst_16 {dimension_numbers = #tpu.dot_dimension_numbers<[1], [0], [0], [1], [0, 0, 1, 1], [], []>} : vector<28x96xbf16>, vector<96x112xbf16>, vector<28x112xf32> -> vector<28x112xf32>
    %17 = arith.addf %7, %16 : vector<28x112xf32>
    %c1_17 = arith.constant 1 : index
    %c0_18 = arith.constant 0 : index
    %c0_19 = arith.constant 0 : index
    %18 = vector.load %arg3[%c1_17, %c0_18, %c0_19] : memref<5x96x112xbf16, #tpu.memory_space<vmem>>, vector<1x96x112xbf16>
    %19 = vector.shape_cast %18 : vector<1x96x112xbf16> to vector<96x112xbf16>
    %cst_20 = arith.constant dense<0.000000e+00> : vector<28x112xf32>
    %20 = tpu.matmul %13, %19, %cst_20 {dimension_numbers = #tpu.dot_dimension_numbers<[1], [0], [0], [1], [0, 0, 1, 1], [], []>} : vector<28x96xbf16>, vector<96x112xbf16>, vector<28x112xf32> -> vector<28x112xf32>
    %21 = arith.addf %11, %20 : vector<28x112xf32>
    %c0_21 = arith.constant 0 : index
    %c2 = arith.constant 2 : index
    %c0_22 = arith.constant 0 : index
    %22 = vector.load %arg1[%c0_21, %c2, %c0_22] : memref<1x32x96xbf16, #tpu.memory_space<vmem>>, vector<1x28x96xbf16>
    %23 = vector.shape_cast %22 : vector<1x28x96xbf16> to vector<28x96xbf16>
    %c2_23 = arith.constant 2 : index
    %c0_24 = arith.constant 0 : index
    %c0_25 = arith.constant 0 : index
    %24 = vector.load %arg2[%c2_23, %c0_24, %c0_25] : memref<5x96x112xbf16, #tpu.memory_space<vmem>>, vector<1x96x112xbf16>
    %25 = vector.shape_cast %24 : vector<1x96x112xbf16> to vector<96x112xbf16>
    %cst_26 = arith.constant dense<0.000000e+00> : vector<28x112xf32>
    %26 = tpu.matmul %23, %25, %cst_26 {dimension_numbers = #tpu.dot_dimension_numbers<[1], [0], [0], [1], [0, 0, 1, 1], [], []>} : vector<28x96xbf16>, vector<96x112xbf16>, vector<28x112xf32> -> vector<28x112xf32>
    %27 = arith.addf %17, %26 : vector<28x112xf32>
    %c2_27 = arith.constant 2 : index
    %c0_28 = arith.constant 0 : index
    %c0_29 = arith.constant 0 : index
    %28 = vector.load %arg3[%c2_27, %c0_28, %c0_29] : memref<5x96x112xbf16, #tpu.memory_space<vmem>>, vector<1x96x112xbf16>
    %29 = vector.shape_cast %28 : vector<1x96x112xbf16> to vector<96x112xbf16>
    %cst_30 = arith.constant dense<0.000000e+00> : vector<28x112xf32>
    %30 = tpu.matmul %23, %29, %cst_30 {dimension_numbers = #tpu.dot_dimension_numbers<[1], [0], [0], [1], [0, 0, 1, 1], [], []>} : vector<28x96xbf16>, vector<96x112xbf16>, vector<28x112xf32> -> vector<28x112xf32>
    %31 = arith.addf %21, %30 : vector<28x112xf32>
    %c0_31 = arith.constant 0 : index
    %c3 = arith.constant 3 : index
    %c0_32 = arith.constant 0 : index
    %32 = vector.load %arg1[%c0_31, %c3, %c0_32] : memref<1x32x96xbf16, #tpu.memory_space<vmem>>, vector<1x28x96xbf16>
    %33 = vector.shape_cast %32 : vector<1x28x96xbf16> to vector<28x96xbf16>
    %c3_33 = arith.constant 3 : index
    %c0_34 = arith.constant 0 : index
    %c0_35 = arith.constant 0 : index
    %34 = vector.load %arg2[%c3_33, %c0_34, %c0_35] : memref<5x96x112xbf16, #tpu.memory_space<vmem>>, vector<1x96x112xbf16>
    %35 = vector.shape_cast %34 : vector<1x96x112xbf16> to vector<96x112xbf16>
    %cst_36 = arith.constant dense<0.000000e+00> : vector<28x112xf32>
    %36 = tpu.matmul %33, %35, %cst_36 {dimension_numbers = #tpu.dot_dimension_numbers<[1], [0], [0], [1], [0, 0, 1, 1], [], []>} : vector<28x96xbf16>, vector<96x112xbf16>, vector<28x112xf32> -> vector<28x112xf32>
    %37 = arith.addf %27, %36 : vector<28x112xf32>
    %c3_37 = arith.constant 3 : index
    %c0_38 = arith.constant 0 : index
    %c0_39 = arith.constant 0 : index
    %38 = vector.load %arg3[%c3_37, %c0_38, %c0_39] : memref<5x96x112xbf16, #tpu.memory_space<vmem>>, vector<1x96x112xbf16>
    %39 = vector.shape_cast %38 : vector<1x96x112xbf16> to vector<96x112xbf16>
    %cst_40 = arith.constant dense<0.000000e+00> : vector<28x112xf32>
    %40 = tpu.matmul %33, %39, %cst_40 {dimension_numbers = #tpu.dot_dimension_numbers<[1], [0], [0], [1], [0, 0, 1, 1], [], []>} : vector<28x96xbf16>, vector<96x112xbf16>, vector<28x112xf32> -> vector<28x112xf32>
    %41 = arith.addf %31, %40 : vector<28x112xf32>
    %c0_41 = arith.constant 0 : index
    %c4 = arith.constant 4 : index
    %c0_42 = arith.constant 0 : index
    %42 = vector.load %arg1[%c0_41, %c4, %c0_42] : memref<1x32x96xbf16, #tpu.memory_space<vmem>>, vector<1x28x96xbf16>
    %43 = vector.shape_cast %42 : vector<1x28x96xbf16> to vector<28x96xbf16>
    %c4_43 = arith.constant 4 : index
    %c0_44 = arith.constant 0 : index
    %c0_45 = arith.constant 0 : index
    %44 = vector.load %arg2[%c4_43, %c0_44, %c0_45] : memref<5x96x112xbf16, #tpu.memory_space<vmem>>, vector<1x96x112xbf16>
    %45 = vector.shape_cast %44 : vector<1x96x112xbf16> to vector<96x112xbf16>
    %cst_46 = arith.constant dense<0.000000e+00> : vector<28x112xf32>
    %46 = tpu.matmul %43, %45, %cst_46 {dimension_numbers = #tpu.dot_dimension_numbers<[1], [0], [0], [1], [0, 0, 1, 1], [], []>} : vector<28x96xbf16>, vector<96x112xbf16>, vector<28x112xf32> -> vector<28x112xf32>
    %47 = arith.addf %37, %46 : vector<28x112xf32>
    %c4_47 = arith.constant 4 : index
    %c0_48 = arith.constant 0 : index
    %c0_49 = arith.constant 0 : index
    %48 = vector.load %arg3[%c4_47, %c0_48, %c0_49] : memref<5x96x112xbf16, #tpu.memory_space<vmem>>, vector<1x96x112xbf16>
    %49 = vector.shape_cast %48 : vector<1x96x112xbf16> to vector<96x112xbf16>
    %cst_50 = arith.constant dense<0.000000e+00> : vector<28x112xf32>
    %50 = tpu.matmul %43, %49, %cst_50 {dimension_numbers = #tpu.dot_dimension_numbers<[1], [0], [0], [1], [0, 0, 1, 1], [], []>} : vector<28x96xbf16>, vector<96x112xbf16>, vector<28x112xf32> -> vector<28x112xf32>
    %51 = arith.addf %41, %50 : vector<28x112xf32>
    %52 = arith.maximumf %47, %51 : vector<28x112xf32>
    %c0_51 = arith.constant 0 : index
    %c0_52 = arith.constant 0 : index
    %53 = vector.load %arg4[%c0_51, %c0_52] : memref<1x112xf32, #tpu.memory_space<vmem>>, vector<1x112xf32>
    %54 = vector.broadcast %53 : vector<1x112xf32> to vector<28x112xf32>
    %55 = arith.addf %52, %54 : vector<28x112xf32>
    %cst_53 = arith.constant 0.000000e+00 : f32
    %56 = vector.broadcast %cst_53 : f32 to vector<32x112xf32>
    %c0_54 = arith.constant 0 : index
    %c0_55 = arith.constant 0 : index
    %57 = vector.load %arg16[%c0_54, %c0_55] : memref<32x112xf32, #tpu.memory_space<vmem>>, vector<32x112xf32>
    tpu.vector_store %arg16[%c0_54, %c0_55], %56 {strides = array<i32>} : memref<32x112xf32, #tpu.memory_space<vmem>>, vector<32x112xf32>,
    %c0_56 = arith.constant 0 : index
    %c0_57 = arith.constant 0 : index
    %58 = vector.load %arg16[%c0_56, %c0_57] : memref<32x112xf32, #tpu.memory_space<vmem>>, vector<28x112xf32>
    tpu.vector_store %arg16[%c0_56, %c0_57], %55 {strides = array<i32>} : memref<32x112xf32, #tpu.memory_space<vmem>>, vector<28x112xf32>,
    %c0_58 = arith.constant 0 : index
    %c0_59 = arith.constant 0 : index
    %59 = vector.load %arg16[%c0_58, %c0_59] : memref<32x112xf32, #tpu.memory_space<vmem>>, vector<28x112xf32>
    %c1_60 = arith.constant 1 : index
    %c0_61 = arith.constant 0 : index
    %60 = vector.load %arg16[%c1_60, %c0_61] : memref<32x112xf32, #tpu.memory_space<vmem>>, vector<28x112xf32>
    %61 = arith.maximumf %59, %60 : vector<28x112xf32>
    %cst_62 = arith.constant 0.000000e+00 : f32
    %62 = vector.broadcast %cst_62 : f32 to vector<28x112xf32>
    %63 = arith.maximumf %61, %62 : vector<28x112xf32>
    %cst_63 = arith.constant 0.000000e+00 : f32
    %64 = vector.broadcast %cst_63 : f32 to vector<32x112xf32>
    %c0_64 = arith.constant 0 : index
    %c0_65 = arith.constant 0 : index
    %65 = vector.load %arg17[%c0_64, %c0_65] : memref<32x112xf32, #tpu.memory_space<vmem>>, vector<32x112xf32>
    tpu.vector_store %arg17[%c0_64, %c0_65], %64 {strides = array<i32>} : memref<32x112xf32, #tpu.memory_space<vmem>>, vector<32x112xf32>,
    %c0_66 = arith.constant 0 : index
    %c0_67 = arith.constant 0 : index
    %66 = vector.load %arg17[%c0_66, %c0_67] : memref<32x112xf32, #tpu.memory_space<vmem>>, vector<28x112xf32>
    tpu.vector_store %arg17[%c0_66, %c0_67], %63 {strides = array<i32>} : memref<32x112xf32, #tpu.memory_space<vmem>>, vector<28x112xf32>,
    %cst_68 = arith.constant 0.000000e+00 : f32
    %67 = vector.broadcast %cst_68 : f32 to vector<20x80xf32>
    %cst_69 = arith.constant 0.000000e+00 : f32
    %68 = vector.broadcast %cst_69 : f32 to vector<20x80xf32>
    %c0_70 = arith.constant 0 : index
    %c0_71 = arith.constant 0 : index
    %69 = vector.load %arg17[%c0_70, %c0_71] : memref<32x112xf32, #tpu.memory_space<vmem>>, vector<20x112xf32>
    %70 = arith.truncf %69 : vector<20x112xf32> to vector<20x112xbf16>
    %c0_72 = arith.constant 0 : index
    %c0_73 = arith.constant 0 : index
    %c0_74 = arith.constant 0 : index
    %71 = vector.load %arg5[%c0_72, %c0_73, %c0_74] : memref<5x112x80xbf16, #tpu.memory_space<vmem>>, vector<1x112x80xbf16>
    %72 = vector.shape_cast %71 : vector<1x112x80xbf16> to vector<112x80xbf16>
    %cst_75 = arith.constant dense<0.000000e+00> : vector<20x80xf32>
    %73 = tpu.matmul %70, %72, %cst_75 {dimension_numbers = #tpu.dot_dimension_numbers<[1], [0], [0], [1], [0, 0, 1, 1], [], []>} : vector<20x112xbf16>, vector<112x80xbf16>, vector<20x80xf32> -> vector<20x80xf32>
    %74 = arith.addf %67, %73 : vector<20x80xf32>
    %c0_76 = arith.constant 0 : index
    %c0_77 = arith.constant 0 : index
    %c0_78 = arith.constant 0 : index
    %75 = vector.load %arg6[%c0_76, %c0_77, %c0_78] : memref<5x112x80xbf16, #tpu.memory_space<vmem>>, vector<1x112x80xbf16>
    %76 = vector.shape_cast %75 : vector<1x112x80xbf16> to vector<112x80xbf16>
    %cst_79 = arith.constant dense<0.000000e+00> : vector<20x80xf32>
    %77 = tpu.matmul %70, %76, %cst_79 {dimension_numbers = #tpu.dot_dimension_numbers<[1], [0], [0], [1], [0, 0, 1, 1], [], []>} : vector<20x112xbf16>, vector<112x80xbf16>, vector<20x80xf32> -> vector<20x80xf32>
    %78 = arith.addf %68, %77 : vector<20x80xf32>
    %c2_80 = arith.constant 2 : index
    %c0_81 = arith.constant 0 : index
    %79 = vector.load %arg17[%c2_80, %c0_81] : memref<32x112xf32, #tpu.memory_space<vmem>>, vector<20x112xf32>
    %80 = arith.truncf %79 : vector<20x112xf32> to vector<20x112xbf16>
    %c1_82 = arith.constant 1 : index
    %c0_83 = arith.constant 0 : index
    %c0_84 = arith.constant 0 : index
    %81 = vector.load %arg5[%c1_82, %c0_83, %c0_84] : memref<5x112x80xbf16, #tpu.memory_space<vmem>>, vector<1x112x80xbf16>
    %82 = vector.shape_cast %81 : vector<1x112x80xbf16> to vector<112x80xbf16>
    %cst_85 = arith.constant dense<0.000000e+00> : vector<20x80xf32>
    %83 = tpu.matmul %80, %82, %cst_85 {dimension_numbers = #tpu.dot_dimension_numbers<[1], [0], [0], [1], [0, 0, 1, 1], [], []>} : vector<20x112xbf16>, vector<112x80xbf16>, vector<20x80xf32> -> vector<20x80xf32>
    %84 = arith.addf %74, %83 : vector<20x80xf32>
    %c1_86 = arith.constant 1 : index
    %c0_87 = arith.constant 0 : index
    %c0_88 = arith.constant 0 : index
    %85 = vector.load %arg6[%c1_86, %c0_87, %c0_88] : memref<5x112x80xbf16, #tpu.memory_space<vmem>>, vector<1x112x80xbf16>
    %86 = vector.shape_cast %85 : vector<1x112x80xbf16> to vector<112x80xbf16>
    %cst_89 = arith.constant dense<0.000000e+00> : vector<20x80xf32>
    %87 = tpu.matmul %80, %86, %cst_89 {dimension_numbers = #tpu.dot_dimension_numbers<[1], [0], [0], [1], [0, 0, 1, 1], [], []>} : vector<20x112xbf16>, vector<112x80xbf16>, vector<20x80xf32> -> vector<20x80xf32>
    %88 = arith.addf %78, %87 : vector<20x80xf32>
    %c4_90 = arith.constant 4 : index
    %c0_91 = arith.constant 0 : index
    %89 = vector.load %arg17[%c4_90, %c0_91] : memref<32x112xf32, #tpu.memory_space<vmem>>, vector<20x112xf32>
    %90 = arith.truncf %89 : vector<20x112xf32> to vector<20x112xbf16>
    %c2_92 = arith.constant 2 : index
    %c0_93 = arith.constant 0 : index
    %c0_94 = arith.constant 0 : index
    %91 = vector.load %arg5[%c2_92, %c0_93, %c0_94] : memref<5x112x80xbf16, #tpu.memory_space<vmem>>, vector<1x112x80xbf16>
    %92 = vector.shape_cast %91 : vector<1x112x80xbf16> to vector<112x80xbf16>
    %cst_95 = arith.constant dense<0.000000e+00> : vector<20x80xf32>
    %93 = tpu.matmul %90, %92, %cst_95 {dimension_numbers = #tpu.dot_dimension_numbers<[1], [0], [0], [1], [0, 0, 1, 1], [], []>} : vector<20x112xbf16>, vector<112x80xbf16>, vector<20x80xf32> -> vector<20x80xf32>
    %94 = arith.addf %84, %93 : vector<20x80xf32>
    %c2_96 = arith.constant 2 : index
    %c0_97 = arith.constant 0 : index
    %c0_98 = arith.constant 0 : index
    %95 = vector.load %arg6[%c2_96, %c0_97, %c0_98] : memref<5x112x80xbf16, #tpu.memory_space<vmem>>, vector<1x112x80xbf16>
    %96 = vector.shape_cast %95 : vector<1x112x80xbf16> to vector<112x80xbf16>
    %cst_99 = arith.constant dense<0.000000e+00> : vector<20x80xf32>
    %97 = tpu.matmul %90, %96, %cst_99 {dimension_numbers = #tpu.dot_dimension_numbers<[1], [0], [0], [1], [0, 0, 1, 1], [], []>} : vector<20x112xbf16>, vector<112x80xbf16>, vector<20x80xf32> -> vector<20x80xf32>
    %98 = arith.addf %88, %97 : vector<20x80xf32>
    %c6 = arith.constant 6 : index
    %c0_100 = arith.constant 0 : index
    %99 = vector.load %arg17[%c6, %c0_100] : memref<32x112xf32, #tpu.memory_space<vmem>>, vector<20x112xf32>
    %100 = arith.truncf %99 : vector<20x112xf32> to vector<20x112xbf16>
    %c3_101 = arith.constant 3 : index
    %c0_102 = arith.constant 0 : index
    %c0_103 = arith.constant 0 : index
    %101 = vector.load %arg5[%c3_101, %c0_102, %c0_103] : memref<5x112x80xbf16, #tpu.memory_space<vmem>>, vector<1x112x80xbf16>
    %102 = vector.shape_cast %101 : vector<1x112x80xbf16> to vector<112x80xbf16>
    %cst_104 = arith.constant dense<0.000000e+00> : vector<20x80xf32>
    %103 = tpu.matmul %100, %102, %cst_104 {dimension_numbers = #tpu.dot_dimension_numbers<[1], [0], [0], [1], [0, 0, 1, 1], [], []>} : vector<20x112xbf16>, vector<112x80xbf16>, vector<20x80xf32> -> vector<20x80xf32>
    %104 = arith.addf %94, %103 : vector<20x80xf32>
    %c3_105 = arith.constant 3 : index
    %c0_106 = arith.constant 0 : index
    %c0_107 = arith.constant 0 : index
    %105 = vector.load %arg6[%c3_105, %c0_106, %c0_107] : memref<5x112x80xbf16, #tpu.memory_space<vmem>>, vector<1x112x80xbf16>
    %106 = vector.shape_cast %105 : vector<1x112x80xbf16> to vector<112x80xbf16>
    %cst_108 = arith.constant dense<0.000000e+00> : vector<20x80xf32>
    %107 = tpu.matmul %100, %106, %cst_108 {dimension_numbers = #tpu.dot_dimension_numbers<[1], [0], [0], [1], [0, 0, 1, 1], [], []>} : vector<20x112xbf16>, vector<112x80xbf16>, vector<20x80xf32> -> vector<20x80xf32>
    %108 = arith.addf %98, %107 : vector<20x80xf32>
    %c8 = arith.constant 8 : index
    %c0_109 = arith.constant 0 : index
    %109 = vector.load %arg17[%c8, %c0_109] : memref<32x112xf32, #tpu.memory_space<vmem>>, vector<20x112xf32>
    %110 = arith.truncf %109 : vector<20x112xf32> to vector<20x112xbf16>
    %c4_110 = arith.constant 4 : index
    %c0_111 = arith.constant 0 : index
    %c0_112 = arith.constant 0 : index
    %111 = vector.load %arg5[%c4_110, %c0_111, %c0_112] : memref<5x112x80xbf16, #tpu.memory_space<vmem>>, vector<1x112x80xbf16>
    %112 = vector.shape_cast %111 : vector<1x112x80xbf16> to vector<112x80xbf16>
    %cst_113 = arith.constant dense<0.000000e+00> : vector<20x80xf32>
    %113 = tpu.matmul %110, %112, %cst_113 {dimension_numbers = #tpu.dot_dimension_numbers<[1], [0], [0], [1], [0, 0, 1, 1], [], []>} : vector<20x112xbf16>, vector<112x80xbf16>, vector<20x80xf32> -> vector<20x80xf32>
    %114 = arith.addf %104, %113 : vector<20x80xf32>
    %c4_114 = arith.constant 4 : index
    %c0_115 = arith.constant 0 : index
    %c0_116 = arith.constant 0 : index
    %115 = vector.load %arg6[%c4_114, %c0_115, %c0_116] : memref<5x112x80xbf16, #tpu.memory_space<vmem>>, vector<1x112x80xbf16>
    %116 = vector.shape_cast %115 : vector<1x112x80xbf16> to vector<112x80xbf16>
    %cst_117 = arith.constant dense<0.000000e+00> : vector<20x80xf32>
    %117 = tpu.matmul %110, %116, %cst_117 {dimension_numbers = #tpu.dot_dimension_numbers<[1], [0], [0], [1], [0, 0, 1, 1], [], []>} : vector<20x112xbf16>, vector<112x80xbf16>, vector<20x80xf32> -> vector<20x80xf32>
    %118 = arith.addf %108, %117 : vector<20x80xf32>
    %119 = arith.maximumf %114, %118 : vector<20x80xf32>
    %c0_118 = arith.constant 0 : index
    %c0_119 = arith.constant 0 : index
    %120 = vector.load %arg7[%c0_118, %c0_119] : memref<1x80xf32, #tpu.memory_space<vmem>>, vector<1x80xf32>
    %121 = vector.broadcast %120 : vector<1x80xf32> to vector<20x80xf32>
    %122 = arith.addf %119, %121 : vector<20x80xf32>
    %cst_120 = arith.constant 0.000000e+00 : f32
    %123 = vector.broadcast %cst_120 : f32 to vector<32x80xf32>
    %c0_121 = arith.constant 0 : index
    %c0_122 = arith.constant 0 : index
    %124 = vector.load %arg18[%c0_121, %c0_122] : memref<32x80xf32, #tpu.memory_space<vmem>>, vector<32x80xf32>
    tpu.vector_store %arg18[%c0_121, %c0_122], %123 {strides = array<i32>} : memref<32x80xf32, #tpu.memory_space<vmem>>, vector<32x80xf32>,
    %c0_123 = arith.constant 0 : index
    %c0_124 = arith.constant 0 : index
    %125 = vector.load %arg18[%c0_123, %c0_124] : memref<32x80xf32, #tpu.memory_space<vmem>>, vector<20x80xf32>
    tpu.vector_store %arg18[%c0_123, %c0_124], %122 {strides = array<i32>} : memref<32x80xf32, #tpu.memory_space<vmem>>, vector<20x80xf32>,
    %c0_125 = arith.constant 0 : index
    %c0_126 = arith.constant 0 : index
    %126 = vector.load %arg18[%c0_125, %c0_126] : memref<32x80xf32, #tpu.memory_space<vmem>>, vector<20x80xf32>
    %c2_127 = arith.constant 2 : index
    %c0_128 = arith.constant 0 : index
    %127 = vector.load %arg18[%c2_127, %c0_128] : memref<32x80xf32, #tpu.memory_space<vmem>>, vector<20x80xf32>
    %128 = arith.maximumf %126, %127 : vector<20x80xf32>
    %cst_129 = arith.constant 0.000000e+00 : f32
    %129 = vector.broadcast %cst_129 : f32 to vector<20x80xf32>
    %130 = arith.maximumf %128, %129 : vector<20x80xf32>
    %131 = arith.truncf %130 : vector<20x80xf32> to vector<20x80xbf16>
    %c0_130 = arith.constant 0 : index
    %c0_131 = arith.constant 0 : index
    %132 = vector.load %arg10[%c0_130, %c0_131] : memref<1x128xf32, #tpu.memory_space<vmem>>, vector<1x128xf32>
    %c0_132 = arith.constant 0 : index
    %c0_133 = arith.constant 0 : index
    %c0_134 = arith.constant 0 : index
    %133 = vector.load %arg8[%c0_132, %c0_133, %c0_134] : memref<5x1x20xbf16, #tpu.memory_space<vmem>>, vector<1x1x20xbf16>
    %134 = vector.shape_cast %133 : vector<1x1x20xbf16> to vector<1x20xbf16>
    %cst_135 = arith.constant dense<0.000000e+00> : vector<1x80xf32>
    %135 = tpu.matmul %134, %131, %cst_135 {dimension_numbers = #tpu.dot_dimension_numbers<[1], [0], [0], [1], [0, 0, 1, 1], [], []>} : vector<1x20xbf16>, vector<20x80xbf16>, vector<1x80xf32> -> vector<1x80xf32>
    %136 = arith.truncf %135 : vector<1x80xf32> to vector<1x80xbf16>
    %c0_136 = arith.constant 0 : index
    %c0_137 = arith.constant 0 : index
    %c0_138 = arith.constant 0 : index
    %137 = vector.load %arg9[%c0_136, %c0_137, %c0_138] : memref<5x80x128xbf16, #tpu.memory_space<vmem>>, vector<1x80x128xbf16>
    %138 = vector.shape_cast %137 : vector<1x80x128xbf16> to vector<80x128xbf16>
    %cst_139 = arith.constant dense<0.000000e+00> : vector<1x128xf32>
    %139 = tpu.matmul %136, %138, %cst_139 {dimension_numbers = #tpu.dot_dimension_numbers<[1], [0], [0], [1], [0, 0, 1, 1], [], []>} : vector<1x80xbf16>, vector<80x128xbf16>, vector<1x128xf32> -> vector<1x128xf32>
    %140 = arith.addf %132, %139 : vector<1x128xf32>
    %c1_140 = arith.constant 1 : index
    %c0_141 = arith.constant 0 : index
    %c0_142 = arith.constant 0 : index
    %141 = vector.load %arg8[%c1_140, %c0_141, %c0_142] : memref<5x1x20xbf16, #tpu.memory_space<vmem>>, vector<1x1x20xbf16>
    %142 = vector.shape_cast %141 : vector<1x1x20xbf16> to vector<1x20xbf16>
    %cst_143 = arith.constant dense<0.000000e+00> : vector<1x80xf32>
    %143 = tpu.matmul %142, %131, %cst_143 {dimension_numbers = #tpu.dot_dimension_numbers<[1], [0], [0], [1], [0, 0, 1, 1], [], []>} : vector<1x20xbf16>, vector<20x80xbf16>, vector<1x80xf32> -> vector<1x80xf32>
    %144 = arith.truncf %143 : vector<1x80xf32> to vector<1x80xbf16>
    %c1_144 = arith.constant 1 : index
    %c0_145 = arith.constant 0 : index
    %c0_146 = arith.constant 0 : index
    %145 = vector.load %arg9[%c1_144, %c0_145, %c0_146] : memref<5x80x128xbf16, #tpu.memory_space<vmem>>, vector<1x80x128xbf16>
    %146 = vector.shape_cast %145 : vector<1x80x128xbf16> to vector<80x128xbf16>
    %cst_147 = arith.constant dense<0.000000e+00> : vector<1x128xf32>
    %147 = tpu.matmul %144, %146, %cst_147 {dimension_numbers = #tpu.dot_dimension_numbers<[1], [0], [0], [1], [0, 0, 1, 1], [], []>} : vector<1x80xbf16>, vector<80x128xbf16>, vector<1x128xf32> -> vector<1x128xf32>
    %148 = arith.addf %140, %147 : vector<1x128xf32>
    %c2_148 = arith.constant 2 : index
    %c0_149 = arith.constant 0 : index
    %c0_150 = arith.constant 0 : index
    %149 = vector.load %arg8[%c2_148, %c0_149, %c0_150] : memref<5x1x20xbf16, #tpu.memory_space<vmem>>, vector<1x1x20xbf16>
    %150 = vector.shape_cast %149 : vector<1x1x20xbf16> to vector<1x20xbf16>
    %cst_151 = arith.constant dense<0.000000e+00> : vector<1x80xf32>
    %151 = tpu.matmul %150, %131, %cst_151 {dimension_numbers = #tpu.dot_dimension_numbers<[1], [0], [0], [1], [0, 0, 1, 1], [], []>} : vector<1x20xbf16>, vector<20x80xbf16>, vector<1x80xf32> -> vector<1x80xf32>
    %152 = arith.truncf %151 : vector<1x80xf32> to vector<1x80xbf16>
    %c2_152 = arith.constant 2 : index
    %c0_153 = arith.constant 0 : index
    %c0_154 = arith.constant 0 : index
    %153 = vector.load %arg9[%c2_152, %c0_153, %c0_154] : memref<5x80x128xbf16, #tpu.memory_space<vmem>>, vector<1x80x128xbf16>
    %154 = vector.shape_cast %153 : vector<1x80x128xbf16> to vector<80x128xbf16>
    %cst_155 = arith.constant dense<0.000000e+00> : vector<1x128xf32>
    %155 = tpu.matmul %152, %154, %cst_155 {dimension_numbers = #tpu.dot_dimension_numbers<[1], [0], [0], [1], [0, 0, 1, 1], [], []>} : vector<1x80xbf16>, vector<80x128xbf16>, vector<1x128xf32> -> vector<1x128xf32>
    %156 = arith.addf %148, %155 : vector<1x128xf32>
    %c3_156 = arith.constant 3 : index
    %c0_157 = arith.constant 0 : index
    %c0_158 = arith.constant 0 : index
    %157 = vector.load %arg8[%c3_156, %c0_157, %c0_158] : memref<5x1x20xbf16, #tpu.memory_space<vmem>>, vector<1x1x20xbf16>
    %158 = vector.shape_cast %157 : vector<1x1x20xbf16> to vector<1x20xbf16>
    %cst_159 = arith.constant dense<0.000000e+00> : vector<1x80xf32>
    %159 = tpu.matmul %158, %131, %cst_159 {dimension_numbers = #tpu.dot_dimension_numbers<[1], [0], [0], [1], [0, 0, 1, 1], [], []>} : vector<1x20xbf16>, vector<20x80xbf16>, vector<1x80xf32> -> vector<1x80xf32>
    %160 = arith.truncf %159 : vector<1x80xf32> to vector<1x80xbf16>
    %c3_160 = arith.constant 3 : index
    %c0_161 = arith.constant 0 : index
    %c0_162 = arith.constant 0 : index
    %161 = vector.load %arg9[%c3_160, %c0_161, %c0_162] : memref<5x80x128xbf16, #tpu.memory_space<vmem>>, vector<1x80x128xbf16>
    %162 = vector.shape_cast %161 : vector<1x80x128xbf16> to vector<80x128xbf16>
    %cst_163 = arith.constant dense<0.000000e+00> : vector<1x128xf32>
    %163 = tpu.matmul %160, %162, %cst_163 {dimension_numbers = #tpu.dot_dimension_numbers<[1], [0], [0], [1], [0, 0, 1, 1], [], []>} : vector<1x80xbf16>, vector<80x128xbf16>, vector<1x128xf32> -> vector<1x128xf32>
    %164 = arith.addf %156, %163 : vector<1x128xf32>
    %c4_164 = arith.constant 4 : index
    %c0_165 = arith.constant 0 : index
    %c0_166 = arith.constant 0 : index
    %165 = vector.load %arg8[%c4_164, %c0_165, %c0_166] : memref<5x1x20xbf16, #tpu.memory_space<vmem>>, vector<1x1x20xbf16>
    %166 = vector.shape_cast %165 : vector<1x1x20xbf16> to vector<1x20xbf16>
    %cst_167 = arith.constant dense<0.000000e+00> : vector<1x80xf32>
    %167 = tpu.matmul %166, %131, %cst_167 {dimension_numbers = #tpu.dot_dimension_numbers<[1], [0], [0], [1], [0, 0, 1, 1], [], []>} : vector<1x20xbf16>, vector<20x80xbf16>, vector<1x80xf32> -> vector<1x80xf32>
    %168 = arith.truncf %167 : vector<1x80xf32> to vector<1x80xbf16>
    %c4_168 = arith.constant 4 : index
    %c0_169 = arith.constant 0 : index
    %c0_170 = arith.constant 0 : index
    %169 = vector.load %arg9[%c4_168, %c0_169, %c0_170] : memref<5x80x128xbf16, #tpu.memory_space<vmem>>, vector<1x80x128xbf16>
    %170 = vector.shape_cast %169 : vector<1x80x128xbf16> to vector<80x128xbf16>
    %cst_171 = arith.constant dense<0.000000e+00> : vector<1x128xf32>
    %171 = tpu.matmul %168, %170, %cst_171 {dimension_numbers = #tpu.dot_dimension_numbers<[1], [0], [0], [1], [0, 0, 1, 1], [], []>} : vector<1x80xbf16>, vector<80x128xbf16>, vector<1x128xf32> -> vector<1x128xf32>
    %172 = arith.addf %164, %171 : vector<1x128xf32>
    %cst_172 = arith.constant 0.000000e+00 : f32
    %173 = vector.broadcast %cst_172 : f32 to vector<1x128xf32>
    %174 = arith.maximumf %172, %173 : vector<1x128xf32>
    %175 = arith.truncf %174 : vector<1x128xf32> to vector<1x128xbf16>
    %c0_173 = arith.constant 0 : index
    %c0_174 = arith.constant 0 : index
    %176 = vector.load %arg11[%c0_173, %c0_174] : memref<128x128xbf16, #tpu.memory_space<vmem>>, vector<128x128xbf16>
    %cst_175 = arith.constant dense<0.000000e+00> : vector<1x128xf32>
    %177 = tpu.matmul %175, %176, %cst_175 {dimension_numbers = #tpu.dot_dimension_numbers<[1], [0], [0], [1], [0, 0, 1, 1], [], []>} : vector<1x128xbf16>, vector<128x128xbf16>, vector<1x128xf32> -> vector<1x128xf32>
    %c0_176 = arith.constant 0 : index
    %c0_177 = arith.constant 0 : index
    %178 = vector.load %arg12[%c0_176, %c0_177] : memref<1x128xf32, #tpu.memory_space<vmem>>, vector<1x128xf32>
    %179 = arith.addf %177, %178 : vector<1x128xf32>
    %cst_178 = arith.constant 0.000000e+00 : f32
    %180 = vector.broadcast %cst_178 : f32 to vector<1x128xf32>
    %181 = arith.maximumf %179, %180 : vector<1x128xf32>
    %182 = arith.truncf %181 : vector<1x128xf32> to vector<1x128xbf16>
    %c0_179 = arith.constant 0 : index
    %c0_180 = arith.constant 0 : index
    %183 = vector.load %arg13[%c0_179, %c0_180] : memref<128x128xbf16, #tpu.memory_space<vmem>>, vector<128x128xbf16>
    %cst_181 = arith.constant dense<0.000000e+00> : vector<1x128xf32>
    %184 = tpu.matmul %182, %183, %cst_181 {dimension_numbers = #tpu.dot_dimension_numbers<[1], [0], [0], [1], [0, 0, 1, 1], [], []>} : vector<1x128xbf16>, vector<128x128xbf16>, vector<1x128xf32> -> vector<1x128xf32>
    %c0_182 = arith.constant 0 : index
    %c0_183 = arith.constant 0 : index
    %185 = vector.load %arg14[%c0_182, %c0_183] : memref<1x128xf32, #tpu.memory_space<vmem>>, vector<1x128xf32>
    %186 = arith.addf %184, %185 : vector<1x128xf32>
    %c0_184 = arith.constant 0 : index
    %c0_185 = arith.constant 0 : index
    %c0_186 = arith.constant 0 : index
    %187 = vector.load %arg15[%c0_184, %c0_185, %c0_186] : memref<1x1x128xf32, #tpu.memory_space<vmem>>, vector<1x1x128xf32>
    %188 = vector.shape_cast %187 : vector<1x1x128xf32> to vector<1x128xf32>
    %189 = vector.shape_cast %186 : vector<1x128xf32> to vector<1x1x128xf32>
    tpu.vector_store %arg15[%c0_184, %c0_185, %c0_186], %189 {strides = array<i32>} : memref<1x1x128xf32, #tpu.memory_space<vmem>>, vector<1x1x128xf32>,
    return
  }
  func.func @transform_0(%arg0: i32) -> (i32, i32, i32) {
    %c0_i32 = arith.constant 0 : i32
    %c0_i32_0 = arith.constant 0 : i32
    %c0_i32_1 = arith.constant 0 : i32
    return %arg0, %c0_i32, %c0_i32_0 : i32, i32, i32
  }
  func.func @transform_1(%arg0: i32) -> (i32, i32, i32) {
    %c0_i32 = arith.constant 0 : i32
    %c0_i32_0 = arith.constant 0 : i32
    %c0_i32_1 = arith.constant 0 : i32
    %c0_i32_2 = arith.constant 0 : i32
    return %c0_i32, %c0_i32_0, %c0_i32_1 : i32, i32, i32
  }
  func.func @transform_2(%arg0: i32) -> (i32, i32, i32) {
    %c0_i32 = arith.constant 0 : i32
    %c0_i32_0 = arith.constant 0 : i32
    %c0_i32_1 = arith.constant 0 : i32
    %c0_i32_2 = arith.constant 0 : i32
    return %c0_i32, %c0_i32_0, %c0_i32_1 : i32, i32, i32
  }
  func.func @transform_3(%arg0: i32) -> (i32, i32) {
    %c0_i32 = arith.constant 0 : i32
    %c0_i32_0 = arith.constant 0 : i32
    %c0_i32_1 = arith.constant 0 : i32
    return %c0_i32, %c0_i32_0 : i32, i32
  }
  func.func @transform_4(%arg0: i32) -> (i32, i32, i32) {
    %c0_i32 = arith.constant 0 : i32
    %c0_i32_0 = arith.constant 0 : i32
    %c0_i32_1 = arith.constant 0 : i32
    %c0_i32_2 = arith.constant 0 : i32
    return %c0_i32, %c0_i32_0, %c0_i32_1 : i32, i32, i32
  }
  func.func @transform_5(%arg0: i32) -> (i32, i32, i32) {
    %c0_i32 = arith.constant 0 : i32
    %c0_i32_0 = arith.constant 0 : i32
    %c0_i32_1 = arith.constant 0 : i32
    %c0_i32_2 = arith.constant 0 : i32
    return %c0_i32, %c0_i32_0, %c0_i32_1 : i32, i32, i32
  }
  func.func @transform_6(%arg0: i32) -> (i32, i32) {
    %c0_i32 = arith.constant 0 : i32
    %c0_i32_0 = arith.constant 0 : i32
    %c0_i32_1 = arith.constant 0 : i32
    return %c0_i32, %c0_i32_0 : i32, i32
  }
  func.func @transform_7(%arg0: i32) -> (i32, i32, i32) {
    %c0_i32 = arith.constant 0 : i32
    %c0_i32_0 = arith.constant 0 : i32
    %c0_i32_1 = arith.constant 0 : i32
    %c0_i32_2 = arith.constant 0 : i32
    return %c0_i32, %c0_i32_0, %c0_i32_1 : i32, i32, i32
  }
  func.func @transform_8(%arg0: i32) -> (i32, i32, i32) {
    %c0_i32 = arith.constant 0 : i32
    %c0_i32_0 = arith.constant 0 : i32
    %c0_i32_1 = arith.constant 0 : i32
    %c0_i32_2 = arith.constant 0 : i32
    return %c0_i32, %c0_i32_0, %c0_i32_1 : i32, i32, i32
  }
  func.func @transform_9(%arg0: i32) -> (i32, i32) {
    %c0_i32 = arith.constant 0 : i32
    %c0_i32_0 = arith.constant 0 : i32
    %c0_i32_1 = arith.constant 0 : i32
    return %c0_i32, %c0_i32_0 : i32, i32
  }
  func.func @transform_10(%arg0: i32) -> (i32, i32) {
    %c0_i32 = arith.constant 0 : i32
    %c0_i32_0 = arith.constant 0 : i32
    %c0_i32_1 = arith.constant 0 : i32
    return %c0_i32, %c0_i32_0 : i32, i32
  }
  func.func @transform_11(%arg0: i32) -> (i32, i32) {
    %c0_i32 = arith.constant 0 : i32
    %c0_i32_0 = arith.constant 0 : i32
    %c0_i32_1 = arith.constant 0 : i32
    return %c0_i32, %c0_i32_0 : i32, i32
  }
  func.func @transform_12(%arg0: i32) -> (i32, i32) {
    %c0_i32 = arith.constant 0 : i32
    %c0_i32_0 = arith.constant 0 : i32
    %c0_i32_1 = arith.constant 0 : i32
    return %c0_i32, %c0_i32_0 : i32, i32
  }
  func.func @transform_13(%arg0: i32) -> (i32, i32) {
    %c0_i32 = arith.constant 0 : i32
    %c0_i32_0 = arith.constant 0 : i32
    %c0_i32_1 = arith.constant 0 : i32
    return %c0_i32, %c0_i32_0 : i32, i32
  }
  func.func @transform_14(%arg0: i32) -> (i32, i32, i32) {
    %c0_i32 = arith.constant 0 : i32
    %c0_i32_0 = arith.constant 0 : i32
    %c0_i32_1 = arith.constant 0 : i32
    return %arg0, %c0_i32, %c0_i32_0 : i32, i32, i32
  }
}

</mosaic_0001>

<bundles_post_ra>
// kernel: lenet_forward.1
= control target key start
LH: loop header
LB: loop body
LE: loop exit
PB: predicated region body
PF: predicated region fallthrough
CT: control target
= control target key end

     0   :  { %19 = vsyncpa [#allocation6], 0  ;;  %s6214_s0 = inlined_call_operand.vmem [shape: bf16[2,32,96], index: 0, kind: input, shape index: {}]   ;;  %s6215_s1 = inlined_call_operand.vmem [shape: bf16[5,96,112], index: 1, kind: input, shape index: {}]   ;;  %s6216_s2 = inlined_call_operand.vmem [shape: bf16[5,96,112], index: 2, kind: input, shape index: {}]   ;;  %s6217_s3 = inlined_call_operand.vmem [shape: f32[1,112], index: 3, kind: input, shape index: {}]   ;;  %s6218_s4 = inlined_call_operand.vmem [shape: bf16[5,112,80], index: 4, kind: input, shape index: {}]   ;;  %s6219_s5 = inlined_call_operand.vmem [shape: bf16[5,112,80], index: 5, kind: input, shape index: {}]   ;;  %s6220_s6 = inlined_call_operand.vmem [shape: f32[1,80], index: 6, kind: input, shape index: {}]   ;;  %s6221_s7 = inlined_call_operand.vmem [shape: bf16[5,1,20], index: 7, kind: input, shape index: {}]   ;;  %s6222_s8 = inlined_call_operand.vmem [shape: bf16[5,80,128], index: 8, kind: input, shape index: {}]   ;;  %s6223_s9 = inlined_call_operand.vmem [shape: f32[1,128], index: 9, kind: input, shape index: {}]   ;;  %s6224_s10 = inlined_call_operand.vmem [shape: bf16[128,128], index: 10, kind: input, shape index: {}]   ;;  %s6225_s11 = inlined_call_operand.vmem [shape: f32[1,128], index: 11, kind: input, shape index: {}]   ;;  %s6226_s12 = inlined_call_operand.vmem [shape: bf16[128,128], index: 12, kind: input, shape index: {}]   ;;  %s6227_s13 = inlined_call_operand.vmem [shape: f32[1,128], index: 13, kind: input, shape index: {}]   ;;  %s6228_s14 = inlined_call_operand.hbm [shape: f32[2,1,128], index: 14, kind: output, shape index: {}]  }
   0x1   :  { %21 = vsyncpa [#allocation6 + $0x1], 0  ;;  %s5373_s29 = smov 0   ;;  %s5375_s30 = smov 0  }
   0x2   :  { %s5377_s15 = smov 0   ;;  %s5379_s16 = smov 0  }
   0x3 LB: > { %6233 = sst [smem:[#allocation8_spill]] %s5289_s15  ;;  %s5394_s17 = sadd.s32 4294967295, %s5293_s16   ;;  %s5293_s16 = sphi %s5379_s16, %s6240_s16   ;;  %s5289_s15 = sphi %s5377_s15, %s6242_s15   ;;  %s5285_s30 = sphi %s5375_s30, %s6244_s30   ;;  %s5281_s29 = sphi %s5373_s29, %s6243_s29  }
   0x4   : > { %s3718_s18 = sadd.s32 4294967294, %s5293_s16   ;;  %s5398_s19 = sadd.s32 1, %s5293_s16  }
   0x5   : > { %6234 = sst [smem:[#allocation9_spill]] %s5398_s19  ;;  %s333_s20 = sadd.s32 1, %s5289_s15 }
   0x6   : > { %s330_s21 = ssub.s32 %s5293_s16, %s5398_s19  ;;  %p343_p0 = scmp.ne.s32.totalorder %s5289_s15, %s5285_s30 }
   0x7   : > { %p331_p1 = scmp.eq.s32.totalorder %s330_s21, 0  ;;  %p344_p2 = scmp.eq.s32.totalorder %s5394_s17, 1 }
   0x8   : > { %p349_p3 = scmp.ne.s32.totalorder %s5285_s30, %s5281_s29  ;;  %p350_p4 = scmp.eq.s32.totalorder %s3718_s18, 1 }
   0x9   : > { %s5409_s22 = scalar_select %p331_p1, %s5289_s15, %s333_s20  }
   0xa   : > { %p5411_p5 = por %p344_p2, %p343_p0  ;;  %p5415_p6 = por %p350_p4, %p349_p3 }
   0xb   : > { %6235 = sst [smem:[#allocation10_spill]] %s5409_s22  ;;  %p3721_p7 = scmp.ge.s32.totalorder %s5293_s16, 1 }
   0xc   : > { %s6237_s24 = scalar_select %p5415_p6, 1, 0 }
   0xd   : > { %p415_p8 = scmp.lt.s32.totalorder %s5293_s16, 3 }
   0xe   : > { %6238 = sst [smem:[#allocation11_spill]] %s6237_s24 }
   0xf   : > { %p416_p9 = pnand %p3721_p7, %p415_p8 }
  0x10   : > { %v5054_v0 = vld [vmem:[%s6215_s1 + $0x30] sm:$0xff] (!%p416_p9)   ;;  %p460_p10 = scmp.lt.s32.totalorder (!%p416_p9), %s5394_s17, 1  ;;  %v5056_v2 = vld [vmem:[%s6215_s1 + $0x38] sm:$0xff] (!%p416_p9)   ;;  %v5058_v4 = vld [vmem:[%s6215_s1 + $0x40] sm:$0xff] (!%p416_p9)   ;;  %vm570_vm0 = vcmask (!%p416_p9), 785408   ;;  %vm919_vm2 = vcmask (!%p416_p9), 1046528  }
  0x11   : > { %419 = sbr.rel (%p416_p9) target bundleno = 1694 (0x69e), region = 76  ;;  %v5055_v1 = vld [vmem:[%s6216_s2 + $0x30] sm:$0xff] (!%p416_p9)   ;;  %4442 = vmatprep.subr.bf16.mxu0 (!%p416_p9), %v5054_v0  ;;  %v5057_v3 = vld [vmem:[%s6216_s2 + $0x38] sm:$0xff] (!%p416_p9)   ;;  %v5059_v5 = vld [vmem:[%s6216_s2 + $0x40] sm:$0xff] (!%p416_p9)   ;;  %vm518_vm1 = vsmask.f32 (!%p416_p9), 7424 }
  0x12   : > { %4474 = vmatprep.subr.bf16.mxu1 (!%p416_p9), %v5055_v1  ;;  %4443 = vmatpush3.bf16.msra.mxu0 (!%p416_p9), %v5054_v0  ;;  %v5060_v6 = vld [vmem:[%s6215_s1 + $0x48] sm:$0xff] (!%p416_p9)   ;;  %v5062_v8 = vld [vmem:[%s6215_s1 + $0x50] sm:$0xff] (!%p416_p9)   ;;  %v5064_v18 = vld [vmem:[%s6215_s1 + $0x58] sm:$0xff] (!%p416_p9)   ;;  %vm1137_vm3 = vsmask.f32 (!%p416_p9), 6400  ;;  %vm1369_vm4 = vcmask (!%p416_p9), 1045504  }
  0x13   : > { %4475 = vmatpush3.bf16.msra.mxu1 (!%p416_p9), %v5055_v1  ;;  %4444 = vmatprep.subr.bf16.mxu0 (!%p416_p9), %v5056_v2  ;;  %v5061_v7 = vld [vmem:[%s6216_s2 + $0x48] sm:$0xff] (!%p416_p9)   ;;  %v5063_v12 = vld [vmem:[%s6216_s2 + $0x50] sm:$0xff] (!%p416_p9)   ;;  %v5065_v20 = vld [vmem:[%s6216_s2 + $0x58] sm:$0xff] (!%p416_p9)   ;;  %vm1585_vm5 = vcmask (!%p416_p9), 916480   ;;  %vm1593_vm6 = vcmask (!%p416_p9), 912384   ;;  %vm2753_vm7 = vcmask (!%p416_p9), 654336  }
  0x14   : > { %4476 = vmatprep.subr.bf16.mxu1 (!%p416_p9), %v5057_v3  ;;  %v5069_v25 = vld [vmem:[%s6215_s1] sm:$0xff] (!%p416_p9)   ;;  %v5071_v29 = vld [vmem:[%s6215_s1 + $0x8] sm:$0xff] (!%p416_p9)   ;;  %v5073_v31 = vld [vmem:[%s6215_s1 + $0x10] sm:$0xff] (!%p416_p9)   ;;  %vm5296_vm8 = vmmov (!%p416_p9), 0   ;;  %vm2760_vm9 = vcmask (!%p416_p9), 650240   ;;  %vm2782_vm10 = vcmask (!%p416_p9), 1041408  }
  0x15   : > { %v5070_v27 = vld [vmem:[%s6216_s2] sm:$0xff] (!%p416_p9)   ;;  %v5072_v30 = vld [vmem:[%s6216_s2 + $0x8] sm:$0xff] (!%p416_p9)   ;;  %v5074_v32 = vld [vmem:[%s6216_s2 + $0x10] sm:$0xff] (!%p416_p9)   ;;  %vm2778_vm11 = vcmask (!%p416_p9), 162816   ;;  %s458_s25 = sand.u32 (!%p416_p9), 1, %s5285_s30   ;;  %s5297_s22 = smov (!%p416_p9), [#allocation5]  }
  0x16   : > { %4445 = vmatpush3.bf16.msra.mxu0 (!%p416_p9), %v5056_v2  ;;  %v5075_v33 = vld [vmem:[%s6215_s1 + $0x18] sm:$0xff] (!%p416_p9)   ;;  %v5077_v35 = vld [vmem:[%s6215_s1 + $0x20] sm:$0xff] (!%p416_p9)   ;;  %v5079_v38 = vld [vmem:[%s6215_s1 + $0x28] sm:$0xff] (!%p416_p9)   ;;  %s459_s27 = scalar_lea.vmem (!%p416_p9), [#allocation5], %s458_s25  ;;  %s3651_s15 = scalar_lea.sflag (!%p416_p9), [#allocation6], %s458_s25 }
  0x17   : > { %4477 = vmatpush3.bf16.msra.mxu1 (!%p416_p9), %v5057_v3  ;;  %4446 = vmatprep.subr.bf16.mxu0 (!%p416_p9), %v5058_v4  ;;  %v5076_v34 = vld [vmem:[%s6216_s2 + $0x18] sm:$0xff] (!%p416_p9)   ;;  %v5078_v36 = vld [vmem:[%s6216_s2 + $0x20] sm:$0xff] (!%p416_p9)   ;;  %v5080_v39 = vld [vmem:[%s6216_s2 + $0x28] sm:$0xff] (!%p416_p9)   ;;  %s3663_s19 = sshll.u32 (!%p416_p9), %s459_s27, 4  ;;  %s5235_s26 = sshll.u32 (!%p416_p9), %s5297_s22, 4  ;;  %s6174_s19 = int_to_ptr.vmem [resolvable:$true] %s3663_s19  ;;  %s5236_s26 = int_to_ptr.vmem [resolvable:$false] %s5235_s26 }
  0x18   : > { %s461_s21 = scalar_select %p460_p10, %s5394_s17, 1  ;;  %4478 = vmatprep.subr.bf16.mxu1 %v5059_v5  ;;  %v5081_v42 = vld [vmem:[%s6215_s1 + $0x60] sm:$0xff]   ;;  %v5084_v48 = vld [vmem:[%s6215_s1 + $0x68] sm:$0xff]   ;;  %v5086_v52 = vld [vmem:[%s6215_s1 + $0x70] sm:$0xff]  }
  0x19   : > { %v5082_v43 = vld [vmem:[%s6216_s2 + $0x60] sm:$0xff]   ;;  %v5085_v49 = vld [vmem:[%s6216_s2 + $0x68] sm:$0xff]   ;;  %v5087_v53 = vld [vmem:[%s6216_s2 + $0x70] sm:$0xff]   ;;  %p5238_p0 = scmp.lt.s32.totalorder %s6174_s19, %s5236_s26 }
  0x1a   : > { %s4208_s18 = sshll.u32 %s461_s21, 4  ;;  %4447 = vmatpush3.bf16.msra.mxu0 %v5058_v4  ;;  %v5088_v55 = vld [vmem:[%s6215_s1 + $0x78] sm:$0xff]   ;;  %v5090_v60 = vld [vmem:[%s6215_s1 + $0x80] sm:$0xff]   ;;  %v5092_v0 = vld [vmem:[%s6215_s1 + $0x88] sm:$0xff]   ;;  %s4205_s21 = sshll.u32 %s5394_s17, 4 }
  0x1b   : > { %s5450_s24 = scalar_lea.vmem %s6214_s0, %s4208_s18  ;;  %4479 = vmatpush3.bf16.msra.mxu1 %v5059_v5  ;;  %4448 = vmatprep.subr.bf16.mxu0 %v5060_v6  ;;  %v5089_v57 = vld [vmem:[%s6216_s2 + $0x78] sm:$0xff]   ;;  %v5091_v62 = vld [vmem:[%s6216_s2 + $0x80] sm:$0xff]   ;;  %v5093_v3 = vld [vmem:[%s6216_s2 + $0x88] sm:$0xff]   ;;  %s6172_s20 = scalar_lea.hbm %s6228_s14, %s4205_s21 }
  0x1c   : > { %v466_v9 = vld [vmem:[%s5450_s24] sm:$0xf]  ;;  %v5457_v10 = vld [vmem:[%s5450_s24 + $0x4] sm:$0xf]  ;;  %v5460_v11 = vld [vmem:[%s5450_s24 + $0x8] sm:$0xf]  ;;  %4480 = vmatprep.subr.bf16.mxu1 %v5061_v7 }
  0x1d   : > { %v494_v13 = vld [vmem:[%s5450_s24 + $0xc] sm:$0x7]  ;;  %v3736_v14 = vcombine.low %v466_v9, %v5457_v10  ;;  %v902_v37 = vld [vmem:[%s5450_s24] sm:$0xe]  ;;  %v5096_v9 = vld [vmem:[%s6216_s2 + $0x90] sm:$0xff]   ;;  %s5231_s17 = scalar_lea.vmem %s6174_s19, 16 }
  0x1e   : > { %v5468_v15 = vcombine.low %v5460_v11, %v494_v13  ;;  %4449 = vmatpush3.bf16.msra.mxu0 %v5060_v6  ;;  %v3795_v40 = vcombine.low %v902_v37, %v5457_v10  ;;  %v469_v41 = vld [vmem:[%s5450_s24 + $0xc] sm:$0x3]  ;;  %v1352_v4 = vld [vmem:[%s5450_s24] sm:$0xc]  ;;  %v5095_v6 = vld [vmem:[%s6215_s1 + $0x90] sm:$0xff]   ;;  %p5232_p11 = scmp.ne.s32.totalorder %s6174_s19, %s5231_s17 }
  0x1f   : > { %v520_v16 = vshrl.u32 %v3736_v14, 16  ;;  %v522_v17 = vshll.u32 %v3736_v14, 16  ;;  %4481 = vmatpush3.bf16.msra.mxu1 %v5061_v7  ;;  %4450 = vmatprep.subr.bf16.mxu0 %v5062_v8  ;;  %v3746_v44 = vcombine.low %v5460_v11, %v469_v41  ;;  %v1120_v47 = vld [vmem:[%s5450_s24 + $0xc] sm:$0xf]  ;;  %v3877_v5 = vcombine.low %v1352_v4, %v5457_v10  ;;  %v5098_v13 = vld [vmem:[%s6216_s2 + $0x98] sm:$0xff]   ;;  %s5237_s24 = scalar_lea.vmem %s5236_s26, 32 }
  0x20   : > { %v527_v19 = vshll.u32 %v5468_v15, 16  ;;  %4482 = vmatprep.subr.bf16.mxu1 %v5063_v12  ;;  %v531_v23 = vshrl.u32 %v5468_v15, 16  ;;  %v920_v45 = vrot.slane %v3795_v40, 1  ;;  %v5531_v46 = vrot.slane %v5468_v15, 1  ;;  %v5121_v37 = vld [vmem:[%s6219_s5 + $0x38] sm:$0xff]   ;;  %v5124_v41 = vld [vmem:[%s6218_s4 + $0x48] sm:$0xff]   ;;  %p5233_p12 = pnand %p5232_p11, %p5411_p5  ;;  %p5239_p1 = scmp.lt.s32.totalorder %s5237_s24, %s5231_s17 }
  0x21   : > { %v524_v21 = vrot.slane %v522_v17, 1  ;;  %v3836_v51 = vcombine.low %v5460_v11, %v1120_v47  ;;  %v1139_v58 = vshrl.u32 %v3795_v40, 16  ;;  %v1142_v2 = vshll.u32 %v3795_v40, 16  ;;  %v5097_v11 = vld [vmem:[%s6215_s1 + $0x98] sm:$0xff]   ;;  %v5101_v17 = vld [vmem:[%s6215_s1 + $0xa8] sm:$0xff]   ;;  %v5123_v40 = vld [vmem:[%s6219_s5 + $0x40] sm:$0xff]  }
  0x22   : > { %v529_v22 = vrot.slane %v527_v19, 1  ;;  %4451 = vmatpush3.bf16.msra.mxu0 %v5062_v8  ;;  %v922_v50 = vsel %vm919_vm2, %v920_v45, %v5531_v46  ;;  %v1370_v8 = vrot.slane %v3877_v5, 2  ;;  %v5103_v19 = vld [vmem:[%s6215_s1 + $0xb0] sm:$0xff]   ;;  %v5128_v45 = vld [vmem:[%s6218_s4 + $0x58] sm:$0xff]   ;;  %v5130_v47 = vld [vmem:[%s6218_s4 + $0x60] sm:$0xff]   ;;  %p5234_p13 = pneg %p5233_p12  ;;  %p5240_p2 = por %p5239_p1, %p5238_p0 }
  0x23   : > { %v525_v24 = vor.u32 %v524_v21, %v520_v16  ;;  %4483 = vmatpush3.bf16.msra.mxu1 %v5063_v12  ;;  %4452 = vmatprep.subr.bf16.mxu0 %v5064_v18  ;;  %v1147_v54 = vshrl.u32 %v3836_v51, 16  ;;  %v1150_v56 = vshll.u32 %v3836_v51, 16  ;;  %v5564_v63 = vrot.slane %v3836_v51, 2  ;;  %v5100_v16 = vld [vmem:[%s6216_s2 + $0xa0] sm:$0xff]   ;;  %v5105_v21 = vld [vmem:[%s6215_s1 + $0xb8] sm:$0xff]  }
  0x24   : > { %4484 = vmatprep.subr.bf16.mxu1 %v5065_v20  ;;  %v533_v28 = vor.u32 %v531_v23, %v529_v22  ;;  %v1141_v1 = vrot.slane %v1139_v58, 1  ;;  %v1144_v7 = vrot.slane %v1142_v2, 2  ;;  %v5107_v23 = vld [vmem:[%s6215_s1 + $0xc0] sm:$0xff]   ;;  %p5241_p3 = pnand %p5240_p2, %p5234_p13 }
  0x25   : > { %v530_v26 = vsel %vm518_vm1, %v525_v24, %v529_v22  ;;  %v1149_v59 = vrot.slane %v1147_v54, 1  ;;  %v1152_v61 = vrot.slane %v1150_v56, 2  ;;  %v5106_v22 = vld [vmem:[%s6216_s2 + $0xb8] sm:$0xff]   ;;  %v5108_v24 = vld [vmem:[%s6216_s2 + $0xc0] sm:$0xff]  }
  0x26   : > { %4454 = vmatprep.mubr.msk.bf16.mxu0 %vm570_vm0, %v530_v26  ;;  %4486 = vmatprep.mubr.msk.bf16.mxu1 %vm570_vm0, %v530_v26  ;;  %v1145_v10 = vor.u32 %v1144_v7, %v1141_v1  ;;  %v5110_v26 = vld [vmem:[%s6216_s2 + $0xc8] sm:$0xff]   ;;  %v5134_v51 = vld [vmem:[%s6218_s4] sm:$0xff]  }
  0x27   : > { %4453 = vmatpush3.bf16.msra.mxu0 %v5064_v18  ;;  %4485 = vmatpush3.bf16.msra.mxu1 %v5065_v20  ;;  %v1153_v12 = vor.u32 %v1152_v61, %v1149_v59  ;;  %v5102_v18 = vld [vmem:[%s6216_s2 + $0xa8] sm:$0xff]   ;;  %v5104_v20 = vld [vmem:[%s6216_s2 + $0xb0] sm:$0xff]  }
  0x28   : > { %4458 = vmatprep.subr.bf16.mxu0 %v5069_v25  ;;  %4490 = vmatprep.subr.bf16.mxu1 %v5070_v27 }
  0x29   : > { %v1154_v15 = vsel %vm1137_vm3, %v1145_v10, %v1153_v12 }
  0x2a   : > { %4455 = vmatmul.mubr.msk.bf16.vlgmr.msra.gmra.mrb[0].mxu0 %vm570_vm0, %v533_v28  ;;  %4487 = vmatmul.mubr.msk.bf16.vlgmr.msra.gmra.mrb[0].mxu1 %vm570_vm0, %v533_v28  ;;  %v1372_v28 = vsel %vm1369_vm4, %v1370_v8, %v5564_v63 }
  0x2b   : > { %4459 = vmatpush3.bf16.msra.mxu0 %v5069_v25  ;;  %4491 = vmatpush3.bf16.msra.mxu1 %v5070_v27  ;;  %v5109_v25 = vld [vmem:[%s6215_s1 + $0xc8] sm:$0xff]   ;;  %v5111_v27 = vld [vmem:[%s6215_s1 + $0xd0] sm:$0xff]  }
  0x2c   : > { %4460 = vmatprep.subr.bf16.mxu0 %v5071_v29  ;;  %4492 = vmatprep.subr.bf16.mxu1 %v5072_v30 }
  0x2d   : > { %4470 = vmatprep.mubr.msk.bf16.mxu0 %vm570_vm0, %v3736_v14  ;;  %4502 = vmatprep.mubr.msk.bf16.mxu1 %vm570_vm0, %v3736_v14  ;;  %v5099_v14 = vld [vmem:[%s6215_s1 + $0xa0] sm:$0xff]  }
  0x2f   : > { %4461 = vmatpush3.bf16.msra.mxu0 %v5071_v29  ;;  %4493 = vmatpush3.bf16.msra.mxu1 %v5072_v30  ;;  %v5112_v29 = vld [vmem:[%s6216_s2 + $0xd0] sm:$0xff]   ;;  %v5113_v30 = vld [vmem:[%s6215_s1 + $0xd8] sm:$0xff]  }
  0x30   : > { %4462 = vmatprep.subr.bf16.mxu0 %v5073_v31  ;;  %4494 = vmatprep.subr.bf16.mxu1 %v5074_v32 }
  0x33   : > { %4463 = vmatpush3.bf16.msra.mxu0 %v5073_v31  ;;  %4495 = vmatpush3.bf16.msra.mxu1 %v5074_v32  ;;  %v5114_v31 = vld [vmem:[%s6216_s2 + $0xd8] sm:$0xff]   ;;  %v5115_v32 = vld [vmem:[%s6215_s1 + $0xe0] sm:$0xff]  }
  0x34   : > { %4464 = vmatprep.subr.bf16.mxu0 %v5075_v33  ;;  %4496 = vmatprep.subr.bf16.mxu1 %v5076_v34 }
  0x37   : > { %4465 = vmatpush3.bf16.msra.mxu0 %v5075_v33  ;;  %4497 = vmatpush3.bf16.msra.mxu1 %v5076_v34  ;;  %v5116_v33 = vld [vmem:[%s6216_s2 + $0xe0] sm:$0xff]   ;;  %v5117_v34 = vld [vmem:[%s6215_s1 + $0xe8] sm:$0xff]  }
  0x38   : > { %4466 = vmatprep.subr.bf16.mxu0 %v5077_v35  ;;  %4498 = vmatprep.subr.bf16.mxu1 %v5078_v36 }
  0x3b   : > { %4467 = vmatpush3.bf16.msra.mxu0 %v5077_v35  ;;  %4499 = vmatpush3.bf16.msra.mxu1 %v5078_v36  ;;  %v5118_v35 = vld [vmem:[%s6216_s2 + $0xe8] sm:$0xff]   ;;  %v5120_v36 = vld [vmem:[%s6218_s4 + $0x38] sm:$0xff]  }
  0x3c   : > { %4468 = vmatprep.subr.bf16.mxu0 %v5079_v38  ;;  %4500 = vmatprep.subr.bf16.mxu1 %v5080_v39 }
  0x3f   : > { %4469 = vmatpush3.bf16.msra.mxu0 %v5079_v38  ;;  %4501 = vmatpush3.bf16.msra.mxu1 %v5080_v39  ;;  %v5295_v38 = vmov 0.0   ;;  %v5122_v39 = vld [vmem:[%s6218_s4 + $0x40] sm:$0xff]  }
  0x40   : > { %4506 = vmatprep.subr.bf16.mxu0 %v5081_v42  ;;  %4522 = vmatprep.subr.bf16.mxu1 %v5082_v43  ;;  %1588 = vst.msk [vmem:[#allocation2 + $0x10] sm:$0xff] %vm1585_vm5, %v5295_v38  ;;  %1586 = vst.msk [vmem:[#allocation2] sm:$0xff] %vm1585_vm5, %v5295_v38 }
  0x41   : > { %1587 = vst.msk [vmem:[#allocation2 + $0x8] sm:$0xff] %vm1585_vm5, %v5295_v38  ;;  %1589 = vst.msk [vmem:[#allocation2 + $0x18] sm:$0xff] %vm1585_vm5, %v5295_v38 }
  0x42   : > { %4471 = vmatmul.mubr.msk.bf16.vlgmr.msra.gmra.mrb[0].mxu0 %vm570_vm0, %v3746_v44  ;;  %4503 = vmatmul.mubr.msk.bf16.vlgmr.msra.gmra.mrb[0].mxu1 %vm570_vm0, %v3746_v44  ;;  %1611 = vst.msk [vmem:[#allocation3] sm:$0xff] %vm1585_vm5, %v5295_v38  ;;  %1612 = vst.msk [vmem:[#allocation3 + $0x8] sm:$0xff] %vm1585_vm5, %v5295_v38  ;;  %v5127_v44 = vld [vmem:[%s6219_s5 + $0x50] sm:$0xff]  }
  0x43   : > { %4507 = vmatpush3.bf16.msra.mxu0 %v5081_v42  ;;  %4523 = vmatpush3.bf16.msra.mxu1 %v5082_v43  ;;  %1613 = vst.msk [vmem:[#allocation3 + $0x10] sm:$0xff] %vm1585_vm5, %v5295_v38  ;;  %1614 = vst.msk [vmem:[#allocation3 + $0x18] sm:$0xff] %vm1585_vm5, %v5295_v38  ;;  %v5125_v42 = vld [vmem:[%s6219_s5 + $0x48] sm:$0xff]   ;;  %v5126_v43 = vld [vmem:[%s6218_s4 + $0x50] sm:$0xff]  }
  0x44   : > { %4508 = vmatprep.subr.bf16.mxu0 %v5084_v48  ;;  %4524 = vmatprep.subr.bf16.mxu1 %v5085_v49  ;;  %2756 = vst.msk [vmem:[#allocation4 + $0x10] sm:$0xff] %vm2753_vm7, %v5295_v38  ;;  %2754 = vst.msk [vmem:[#allocation4] sm:$0xff] %vm2753_vm7, %v5295_v38 }
  0x45   : > { %4518 = vmatprep.mubr.msk.bf16.mxu0 %vm570_vm0, %v922_v50  ;;  %4534 = vmatprep.mubr.msk.bf16.mxu1 %vm570_vm0, %v922_v50  ;;  %v5133_v50 = vld [vmem:[%s6219_s5 + $0x68] sm:$0xff]   ;;  %2755 = vst.msk [vmem:[#allocation4 + $0x8] sm:$0xff] %vm2753_vm7, %v5295_v38 }
  0x47   : > { %4509 = vmatpush3.bf16.msra.mxu0 %v5084_v48  ;;  %4525 = vmatpush3.bf16.msra.mxu1 %v5085_v49  ;;  %v5131_v48 = vld [vmem:[%s6219_s5 + $0x60] sm:$0xff]   ;;  %v5132_v49 = vld [vmem:[%s6218_s4 + $0x68] sm:$0xff]  }
  0x48   : > { %4510 = vmatprep.subr.bf16.mxu0 %v5086_v52  ;;  %4526 = vmatprep.subr.bf16.mxu1 %v5087_v53 }
  0x4b   : > { %4511 = vmatpush3.bf16.msra.mxu0 %v5086_v52  ;;  %4527 = vmatpush3.bf16.msra.mxu1 %v5087_v53  ;;  %v5135_v52 = vld [vmem:[%s6219_s5] sm:$0xff]  }
  0x4c   : > { %4512 = vmatprep.subr.bf16.mxu0 %v5088_v55  ;;  %4528 = vmatprep.subr.bf16.mxu1 %v5089_v57 }
  0x4f   : > { %4513 = vmatpush3.bf16.msra.mxu0 %v5088_v55  ;;  %4529 = vmatpush3.bf16.msra.mxu1 %v5089_v57  ;;  %v3906_v55 = vld [vmem:[%s6217_s3] ss:$0 sm:$0xff] }
  0x50   : > { %4514 = vmatprep.subr.bf16.mxu0 %v5090_v60  ;;  %4530 = vmatprep.subr.bf16.mxu1 %v5091_v62 }
  0x53   : > { %4515 = vmatpush3.bf16.msra.mxu0 %v5090_v60  ;;  %4531 = vmatpush3.bf16.msra.mxu1 %v5091_v62 }
  0x54   : > { %4516 = vmatprep.subr.bf16.mxu0 %v5092_v0  ;;  %4532 = vmatprep.subr.bf16.mxu1 %v5093_v3 }
  0x57   : > { %4517 = vmatpush3.bf16.msra.mxu0 %v5092_v0  ;;  %4533 = vmatpush3.bf16.msra.mxu1 %v5093_v3 }
  0x58   : > { %4538 = vmatprep.subr.bf16.mxu0 %v5095_v6  ;;  %4554 = vmatprep.subr.bf16.mxu1 %v5096_v9 }
  0x5a   : > { %4519 = vmatmul.mubr.msk.bf16.vlgmr.msra.gmra.mrb[0].mxu0 %vm570_vm0, %v5531_v46  ;;  %4535 = vmatmul.mubr.msk.bf16.vlgmr.msra.gmra.mrb[0].mxu1 %vm570_vm0, %v5531_v46  ;;  %v5129_v46 = vld [vmem:[%s6219_s5 + $0x58] sm:$0xff]  }
  0x5b   : > { %4539 = vmatpush3.bf16.msra.mxu0 %v5095_v6  ;;  %4555 = vmatpush3.bf16.msra.mxu1 %v5096_v9 }
  0x5c   : > { %4540 = vmatprep.subr.bf16.mxu0 %v5097_v11  ;;  %4556 = vmatprep.subr.bf16.mxu1 %v5098_v13 }
  0x5d   : > { %4550 = vmatprep.mubr.msk.bf16.mxu0 %vm570_vm0, %v1154_v15  ;;  %4566 = vmatprep.mubr.msk.bf16.mxu1 %vm570_vm0, %v1154_v15 }
  0x5f   : > { %4541 = vmatpush3.bf16.msra.mxu0 %v5097_v11  ;;  %4557 = vmatpush3.bf16.msra.mxu1 %v5098_v13 }
  0x60   : > { %4542 = vmatprep.subr.bf16.mxu0 %v5099_v14  ;;  %4558 = vmatprep.subr.bf16.mxu1 %v5100_v16 }
  0x63   : > { %4543 = vmatpush3.bf16.msra.mxu0 %v5099_v14  ;;  %4559 = vmatpush3.bf16.msra.mxu1 %v5100_v16 }
  0x64   : > { %4544 = vmatprep.subr.bf16.mxu0 %v5101_v17  ;;  %4560 = vmatprep.subr.bf16.mxu1 %v5102_v18 }
  0x67   : > { %4545 = vmatpush3.bf16.msra.mxu0 %v5101_v17  ;;  %4561 = vmatpush3.bf16.msra.mxu1 %v5102_v18 }
  0x68   : > { %4546 = vmatprep.subr.bf16.mxu0 %v5103_v19  ;;  %4562 = vmatprep.subr.bf16.mxu1 %v5104_v20 }
  0x6b   : > { %4547 = vmatpush3.bf16.msra.mxu0 %v5103_v19  ;;  %4563 = vmatpush3.bf16.msra.mxu1 %v5104_v20 }
  0x6c   : > { %4548 = vmatprep.subr.bf16.mxu0 %v5105_v21  ;;  %4564 = vmatprep.subr.bf16.mxu1 %v5106_v22 }
  0x6f   : > { %4549 = vmatpush3.bf16.msra.mxu0 %v5105_v21  ;;  %4565 = vmatpush3.bf16.msra.mxu1 %v5106_v22 }
  0x70   : > { %4570 = vmatprep.subr.bf16.mxu0 %v5107_v23  ;;  %4586 = vmatprep.subr.bf16.mxu1 %v5108_v24 }
  0x72   : > { %4551 = vmatmul.mubr.msk.bf16.vlgmr.msra.gmra.mrb[0].mxu0 %vm570_vm0, %v1153_v12  ;;  %4567 = vmatmul.mubr.msk.bf16.vlgmr.msra.gmra.mrb[0].mxu1 %vm570_vm0, %v1153_v12 }
  0x73   : > { %4571 = vmatpush3.bf16.msra.mxu0 %v5107_v23  ;;  %4587 = vmatpush3.bf16.msra.mxu1 %v5108_v24 }
  0x74   : > { %4572 = vmatprep.subr.bf16.mxu0 %v5109_v25  ;;  %4588 = vmatprep.subr.bf16.mxu1 %v5110_v26 }
  0x75   : > { %4582 = vmatprep.mubr.msk.bf16.mxu0 %vm570_vm0, %v1372_v28  ;;  %4598 = vmatprep.mubr.msk.bf16.mxu1 %vm570_vm0, %v1372_v28 }
  0x77   : > { %4573 = vmatpush3.bf16.msra.mxu0 %v5109_v25  ;;  %4589 = vmatpush3.bf16.msra.mxu1 %v5110_v26 }
  0x78   : > { %4574 = vmatprep.subr.bf16.mxu0 %v5111_v27  ;;  %4590 = vmatprep.subr.bf16.mxu1 %v5112_v29 }
  0x7b   : > { %4575 = vmatpush3.bf16.msra.mxu0 %v5111_v27  ;;  %4591 = vmatpush3.bf16.msra.mxu1 %v5112_v29  ;;  %v5136_v29 = vld [vmem:[%s6218_s4 + $0x8] sm:$0xff]  }
  0x7c   : > { %4576 = vmatprep.subr.bf16.mxu0 %v5113_v30  ;;  %4592 = vmatprep.subr.bf16.mxu1 %v5114_v31 }
  0x7f   : > { %4577 = vmatpush3.bf16.msra.mxu0 %v5113_v30  ;;  %4593 = vmatpush3.bf16.msra.mxu1 %v5114_v31  ;;  %v5137_v30 = vld [vmem:[%s6219_s5 + $0x8] sm:$0xff]  }
  0x80   : > { %4578 = vmatprep.subr.bf16.mxu0 %v5115_v32  ;;  %4594 = vmatprep.subr.bf16.mxu1 %v5116_v33 }
  0x83   : > { %4579 = vmatpush3.bf16.msra.mxu0 %v5115_v32  ;;  %4595 = vmatpush3.bf16.msra.mxu1 %v5116_v33  ;;  %v5138_v32 = vld [vmem:[%s6218_s4 + $0x10] sm:$0xff]  }
  0x84   : > { %4580 = vmatprep.subr.bf16.mxu0 %v5117_v34  ;;  %4596 = vmatprep.subr.bf16.mxu1 %v5118_v35  ;;  %v5139_v33 = vld [vmem:[%s6219_s5 + $0x10] sm:$0xff]  }
  0x87   : > { %4581 = vmatpush3.bf16.msra.mxu0 %v5117_v34  ;;  %4597 = vmatpush3.bf16.msra.mxu1 %v5118_v35  ;;  %v5140_v34 = vld [vmem:[%s6218_s4 + $0x18] sm:$0xff]  }
  0x88   : > { %4602 = vmatprep.subr.bf16.mxu0 %v5120_v36  ;;  %4638 = vmatprep.subr.bf16.mxu1 %v5121_v37  ;;  %v5141_v35 = vld [vmem:[%s6219_s5 + $0x18] sm:$0xff]  }
  0x8a   : > { %4583 = vmatmul.mubr.msk.bf16.vlgmr.msra.gmra.mrb[0].mxu0 %vm570_vm0, %v5564_v63  ;;  %4599 = vmatmul.mubr.msk.bf16.vlgmr.msra.gmra.mrb[0].mxu1 %vm570_vm0, %v5564_v63 }
  0x8b   : > { %4603 = vmatpush3.bf16.msra.mxu0 %v5120_v36  ;;  %4639 = vmatpush3.bf16.msra.mxu1 %v5121_v37  ;;  %v5142_v36 = vld [vmem:[%s6218_s4 + $0x20] sm:$0xff]  }
  0x8c   : > { %4604 = vmatprep.subr.bf16.mxu0 %v5122_v39  ;;  %4640 = vmatprep.subr.bf16.mxu1 %v5123_v40  ;;  %v5143_v37 = vld [vmem:[%s6219_s5 + $0x20] sm:$0xff]  }
  0x8f   : > { %4605 = vmatpush3.bf16.msra.mxu0 %v5122_v39  ;;  %4641 = vmatpush3.bf16.msra.mxu1 %v5123_v40  ;;  %v5144_v39 = vld [vmem:[%s6218_s4 + $0x28] sm:$0xff]  }
  0x90   : > { %4606 = vmatprep.subr.bf16.mxu0 %v5124_v41  ;;  %4642 = vmatprep.subr.bf16.mxu1 %v5125_v42  ;;  %v5145_v40 = vld [vmem:[%s6219_s5 + $0x28] sm:$0xff]  }
  0x93   : > { %4607 = vmatpush3.bf16.msra.mxu0 %v5124_v41  ;;  %4643 = vmatpush3.bf16.msra.mxu1 %v5125_v42  ;;  %v5146_v41 = vld [vmem:[%s6218_s4 + $0x30] sm:$0xff]  }
  0x94   : > { %4608 = vmatprep.subr.bf16.mxu0 %v5126_v43  ;;  %4644 = vmatprep.subr.bf16.mxu1 %v5127_v44  ;;  %v5147_v42 = vld [vmem:[%s6219_s5 + $0x30] sm:$0xff]  }
  0x97   : > { %4609 = vmatpush3.bf16.msra.mxu0 %v5126_v43  ;;  %4645 = vmatpush3.bf16.msra.mxu1 %v5127_v44  ;;  %v5148_v43 = vld [vmem:[%s6218_s4 + $0x70] sm:$0xff]  }
  0x98   : > { %4610 = vmatprep.subr.bf16.mxu0 %v5128_v45  ;;  %4646 = vmatprep.subr.bf16.mxu1 %v5129_v46  ;;  %v5149_v44 = vld [vmem:[%s6219_s5 + $0x70] sm:$0xff]  }
  0x9b   : > { %4611 = vmatpush3.bf16.msra.mxu0 %v5128_v45  ;;  %4647 = vmatpush3.bf16.msra.mxu1 %v5129_v46 }
  0x9c   : > { %4612 = vmatprep.subr.bf16.mxu0 %v5130_v47  ;;  %4648 = vmatprep.subr.bf16.mxu1 %v5131_v48 }
  0x9f   : > { %4613 = vmatpush3.bf16.msra.mxu0 %v5130_v47  ;;  %4649 = vmatpush3.bf16.msra.mxu1 %v5131_v48 }
  0xa0   : > { %4614 = vmatprep.subr.bf16.mxu0 %v5132_v49  ;;  %4650 = vmatprep.subr.bf16.mxu1 %v5133_v50 }
  0xa3   : > { %4615 = vmatpush3.bf16.msra.mxu0 %v5132_v49  ;;  %4651 = vmatpush3.bf16.msra.mxu1 %v5133_v50  ;;  %v5150_v50 = vld [vmem:[%s6218_s4 + $0x78] sm:$0xff]  }
  0xa4   : > { %4620 = vmatprep.subr.bf16.mxu0 %v5134_v51  ;;  %4656 = vmatprep.subr.bf16.mxu1 %v5135_v52 }
 0x15d   : > { %v4584_v53 = vpop.f32.mrb[0].mxu0  ;;  %v4600_v54 = vpop.f32.mrb[0].mxu1 }
 0x15e   : > { %v1449_v56 = vpop.f32.mrb[1].mxu0  ;;  %v1572_v57 = vmax.f32 %v4584_v53, %v4600_v54  ;;  %v1551_v58 = vpop.f32.mrb[1].mxu1  ;;  %v5153_v53 = vld [vmem:[%s6219_s5 + $0x80] sm:$0xff]   ;;  %v5154_v54 = vld [vmem:[%s6218_s4 + $0x88] sm:$0xff]  }
 0x15f   : > { %v4585_v59 = vpop.f32.mrb[2].mxu0  ;;  %v1570_v60 = vmax.f32 %v1449_v56, %v1551_v58  ;;  %v4601_v61 = vpop.f32.mrb[2].mxu1  ;;  %v5156_v56 = vld [vmem:[%s6218_s4 + $0x90] sm:$0xff]   ;;  %v5158_v58 = vld [vmem:[%s6218_s4 + $0x98] sm:$0xff]  }
 0x160   : > { %v1452_v62 = vpop.f32.mrb[3].mxu0  ;;  %v1583_v63 = vadd.f32 %v3906_v55, %v1572_v57  ;;  %v1573_v0 = vmax.f32 %v4585_v59, %v4601_v61  ;;  %v1554_v1 = vpop.f32.mrb[3].mxu1  ;;  %v5157_v57 = vld [vmem:[%s6219_s5 + $0x90] sm:$0xff]   ;;  %v5159_v59 = vld [vmem:[%s6219_s5 + $0x98] sm:$0xff]   ;;  %v5161_v61 = vld [vmem:[%s6219_s5 + $0xa0] sm:$0xff]  }
 0x161   : > { %v1581_v2 = vadd.f32 %v3906_v55, %v1570_v60  ;;  %v1571_v3 = vmax.f32 %v1452_v62, %v1554_v1  ;;  %v5160_v60 = vld [vmem:[%s6218_s4 + $0xa0] sm:$0xff]   ;;  %v5162_v62 = vld [vmem:[%s6218_s4 + $0xa8] sm:$0xff]  }
 0x162   : > { %1592 = vst.msk [vmem:[#allocation2 + $0x10] sm:$0xff] %vm1585_vm5, %v1583_v63  ;;  %v1584_v4 = vadd.f32 %v3906_v55, %v1573_v0  ;;  %v5163_v0 = vld [vmem:[%s6219_s5 + $0xa8] sm:$0xff]  }
 0x163   : > { %1590 = vst.msk [vmem:[#allocation2] sm:$0xff] %vm1585_vm5, %v1581_v2  ;;  %v1582_v5 = vadd.f32 %v3906_v55, %v1571_v3  ;;  %v5155_v55 = vld [vmem:[%s6219_s5 + $0x88] sm:$0xff]  }
 0x164   : > { %1594 = vst.msk [vmem:[#allocation2 + $0x18] sm:$0xf] %vm1593_vm6, %v1584_v4  ;;  %v5164_v4 = vld [vmem:[%s6218_s4 + $0xb0] sm:$0xff]  }
 0x165   : > { %1591 = vst.msk [vmem:[#allocation2 + $0x8] sm:$0xff] %vm1585_vm5, %v1582_v5 }
 0x169   : > { %v1597_v6 = vld [vmem:[#allocation2 + $0x10] sm:$0xff] }
 0x16a   : > { %v1595_v7 = vld [vmem:[#allocation2] sm:$0xff] }
 0x16b   : > { %v1598_v8 = vld [vmem:[#allocation2 + $0x18] sm:$0xf] }
 0x16c   : > { %v1601_v9 = vld [vmem:[#allocation2 + $0x11] sm:$0xff]  ;;  %v1602_v11 = vld [vmem:[#allocation2 + $0x19] sm:$0xf]  ;;  %v1596_v13 = vld [vmem:[#allocation2 + $0x8] sm:$0xff] }
 0x16d   : > { %v1605_v10 = vmax.f32 %v1597_v6, %v1601_v9  ;;  %v1606_v12 = vmax.f32 %v1598_v8, %v1602_v11  ;;  %v1599_v14 = vld [vmem:[#allocation2 + $0x1] sm:$0xff]  ;;  %v1600_v15 = vld [vmem:[#allocation2 + $0x9] sm:$0xff]  ;;  %v5167_v8 = vld [vmem:[%s6219_s5 + $0xb8] sm:$0xff]  }
 0x16e   : > { %v1603_v16 = vmax.f32 %v1595_v7, %v1599_v14  ;;  %v1604_v17 = vmax.f32 %v1596_v13, %v1600_v15  ;;  %v5165_v6 = vld [vmem:[%s6219_s5 + $0xb0] sm:$0xff]   ;;  %v5166_v7 = vld [vmem:[%s6218_s4 + $0xb8] sm:$0xff]   ;;  %v5168_v9 = vld [vmem:[%s6218_s4 + $0xc0] sm:$0xff]  }
 0x16f   : > { %v1609_v18 = vmax.f32 %v1605_v10, 0.0  ;;  %v1610_v19 = vmax.f32 %v1606_v12, 0.0  ;;  %v5169_v11 = vld [vmem:[%s6219_s5 + $0xc0] sm:$0xff]   ;;  %v5170_v10 = vld [vmem:[%s6218_s4 + $0xc8] sm:$0xff]   ;;  %v5172_v13 = vld [vmem:[%s6218_s4 + $0xd0] sm:$0xff]  }
 0x170   : > { %v1607_v20 = vmax.f32 %v1603_v16, 0.0  ;;  %v1608_v21 = vmax.f32 %v1604_v17, 0.0  ;;  %v5171_v12 = vld [vmem:[%s6219_s5 + $0xc8] sm:$0xff]   ;;  %v5173_v14 = vld [vmem:[%s6219_s5 + $0xd0] sm:$0xff]   ;;  %v5174_v15 = vld [vmem:[%s6218_s4 + $0xd8] sm:$0xff]  }
 0x171   : > { %1618 = vst.msk [vmem:[#allocation3 + $0x18] sm:$0xf] %vm1593_vm6, %v1610_v19  ;;  %v5175_v16 = vld [vmem:[%s6219_s5 + $0xd8] sm:$0xff]   ;;  %v5176_v17 = vld [vmem:[%s6218_s4 + $0xe0] sm:$0xff]  }
 0x172   : > { %1617 = vst.msk [vmem:[#allocation3 + $0x10] sm:$0xff] %vm1585_vm5, %v1609_v18  ;;  %1615 = vst.msk [vmem:[#allocation3] sm:$0xff] %vm1585_vm5, %v1607_v20  ;;  %v5177_v19 = vld [vmem:[%s6219_s5 + $0xe0] sm:$0xff]  }
 0x173   : > { %1616 = vst.msk [vmem:[#allocation3 + $0x8] sm:$0xff] %vm1585_vm5, %v1608_v21 }
 0x179   : > { %v1654_v22 = vld [vmem:[#allocation3 + $0x12] sm:$0xf]  ;;  %v1619_v26 = vld [vmem:[#allocation3] sm:$0xff]  ;;  %v2288_v18 = vld [vmem:[#allocation3 + $0x16] sm:$0xf] }
 0x17a   : > { %v1652_v23 = vld [vmem:[#allocation3 + $0x2] sm:$0xff]  ;;  %v1653_v24 = vld [vmem:[#allocation3 + $0xa] sm:$0xff]  ;;  %v1656_v28 = vpack.c.bf16 %v1654_v22, %v1654_v22  ;;  %v2061_v63 = vld [vmem:[#allocation3 + $0x14] sm:$0xf]  ;;  %v2290_v21 = vpack.c.bf16 %v2288_v18, %v2288_v18 }
 0x17b   : > { %v1655_v25 = vpack.c.bf16 %v1653_v24, %v1652_v23  ;;  %v5738_v27 = vld [vmem:[#allocation3 + $0x8] sm:$0xff]  ;;  %v1621_v45 = vld [vmem:[#allocation3 + $0x10] sm:$0xf]  ;;  %v2063_v3 = vpack.c.bf16 %v2061_v63, %v2061_v63  ;;  %v5219_v18 = vld [vmem:[%s6224_s10 + $0x20] sm:$0xff]  }
 0x17c   : > { %v1622_v31 = vpack.c.bf16 %v5738_v27, %v1619_v26  ;;  %v2059_v46 = vld [vmem:[#allocation3 + $0x4] sm:$0xff]  ;;  %v2060_v47 = vld [vmem:[#allocation3 + $0xc] sm:$0xff]  ;;  %v1623_v48 = vpack.c.bf16 %v1621_v45, %v1621_v45  ;;  %v4109_v45 = vld [vmem:[%s6220_s6] ss:$0 sm:$0xff] }
 0x17d   : > { %4616 = vmatprep.mubr.msk.bf16.mxu0 %vm1585_vm5, %v1655_v25  ;;  %4652 = vmatprep.mubr.msk.bf16.mxu1 %vm1585_vm5, %v1655_v25  ;;  %v2062_v49 = vpack.c.bf16 %v2060_v47, %v2059_v46  ;;  %v2286_v1 = vld [vmem:[#allocation3 + $0x6] sm:$0xff]  ;;  %v2287_v2 = vld [vmem:[#allocation3 + $0xe] sm:$0xff] }
 0x17e   : > { %4617 = vmatmul.mubr.msk.bf16.vlgmr.msra.gmra.mrb[4].mxu0 %vm1585_vm5, %v1656_v28  ;;  %4653 = vmatmul.mubr.msk.bf16.vlgmr.msra.gmra.mrb[4].mxu1 %vm1585_vm5, %v1656_v28  ;;  %v2289_v5 = vpack.c.bf16 %v2287_v2, %v2286_v1  ;;  %v2514_v20 = vld [vmem:[#allocation3 + $0x10] sm:$0xff]  ;;  %v5178_v22 = vld [vmem:[%s6218_s4 + $0xe8] sm:$0xff]   ;;  %v5183_v28 = vld [vmem:[%s6219_s5 + $0xf8] sm:$0xff]  }
 0x17f   : > { %4621 = vmatpush3.bf16.msra.mxu0 %v5134_v51  ;;  %4657 = vmatpush3.bf16.msra.mxu1 %v5135_v52  ;;  %v5151_v51 = vld [vmem:[%s6219_s5 + $0x78] sm:$0xff]   ;;  %v5152_v52 = vld [vmem:[%s6218_s4 + $0x80] sm:$0xff]   ;;  %v2516_v23 = vpack.c.bf16 %v2514_v20, %v5738_v27  ;;  %v5179_v24 = vld [vmem:[%s6219_s5 + $0xe8] sm:$0xff]  }
 0x180   : > { %4634 = vmatprep.mubr.msk.bf16.mxu0 %vm1585_vm5, %v1622_v31  ;;  %4670 = vmatprep.mubr.msk.bf16.mxu1 %vm1585_vm5, %v1622_v31  ;;  %v5180_v25 = vld [vmem:[%s6218_s4 + $0xf0] sm:$0xff]   ;;  %v5182_v27 = vld [vmem:[%s6218_s4 + $0xf8] sm:$0xff]   ;;  %v5186_v31 = vld [vmem:[%s6218_s4 + $0x108] sm:$0xff]  }
 0x181   : > { %4622 = vmatprep.subr.bf16.mxu0 %v5136_v29  ;;  %4658 = vmatprep.subr.bf16.mxu1 %v5137_v30  ;;  %v5181_v26 = vld [vmem:[%s6219_s5 + $0xf0] sm:$0xff]  }
 0x183   : > { %4623 = vmatpush3.bf16.msra.mxu0 %v5136_v29  ;;  %4659 = vmatpush3.bf16.msra.mxu1 %v5137_v30  ;;  %v5184_v29 = vld [vmem:[%s6218_s4 + $0x100] sm:$0xff]  }
 0x184   : > { %4624 = vmatprep.subr.bf16.mxu0 %v5138_v32  ;;  %4660 = vmatprep.subr.bf16.mxu1 %v5139_v33  ;;  %v5185_v30 = vld [vmem:[%s6219_s5 + $0x100] sm:$0xff]  }
 0x187   : > { %4625 = vmatpush3.bf16.msra.mxu0 %v5138_v32  ;;  %4661 = vmatpush3.bf16.msra.mxu1 %v5139_v33  ;;  %v5187_v32 = vld [vmem:[%s6219_s5 + $0x108] sm:$0xff]   ;;  %v5188_v33 = vld [vmem:[%s6218_s4 + $0x110] sm:$0xff]  }
 0x188   : > { %4626 = vmatprep.subr.bf16.mxu0 %v5140_v34  ;;  %4662 = vmatprep.subr.bf16.mxu1 %v5141_v35 }
 0x18b   : > { %4627 = vmatpush3.bf16.msra.mxu0 %v5140_v34  ;;  %4663 = vmatpush3.bf16.msra.mxu1 %v5141_v35  ;;  %v5189_v34 = vld [vmem:[%s6219_s5 + $0x110] sm:$0xff]   ;;  %v2515_v35 = vld [vmem:[#allocation3 + $0x18] sm:$0xf] }
 0x18c   : > { %4628 = vmatprep.subr.bf16.mxu0 %v5142_v36  ;;  %4664 = vmatprep.subr.bf16.mxu1 %v5143_v37 }
 0x18f   : > { %4629 = vmatpush3.bf16.msra.mxu0 %v5142_v36  ;;  %4665 = vmatpush3.bf16.msra.mxu1 %v5143_v37  ;;  %v2517_v36 = vpack.c.bf16 %v2515_v35, %v2515_v35  ;;  %v5190_v37 = vld [vmem:[%s6222_s8] sm:$0xff]  }
 0x190   : > { %4630 = vmatprep.subr.bf16.mxu0 %v5144_v39  ;;  %4666 = vmatprep.subr.bf16.mxu1 %v5145_v40 }
 0x193   : > { %4631 = vmatpush3.bf16.msra.mxu0 %v5144_v39  ;;  %4667 = vmatpush3.bf16.msra.mxu1 %v5145_v40  ;;  %v5191_v39 = vld [vmem:[%s6222_s8 + $0x8] sm:$0xff]   ;;  %v5192_v40 = vld [vmem:[%s6222_s8 + $0x10] sm:$0xff]  }
 0x194   : > { %4632 = vmatprep.subr.bf16.mxu0 %v5146_v41  ;;  %4668 = vmatprep.subr.bf16.mxu1 %v5147_v42 }
 0x197   : > { %4633 = vmatpush3.bf16.msra.mxu0 %v5146_v41  ;;  %4669 = vmatpush3.bf16.msra.mxu1 %v5147_v42  ;;  %v5193_v41 = vld [vmem:[%s6222_s8 + $0x18] sm:$0xff]   ;;  %v5194_v42 = vld [vmem:[%s6222_s8 + $0x20] sm:$0xff]  }
 0x198   : > { %4674 = vmatprep.subr.bf16.mxu0 %v5148_v43  ;;  %4692 = vmatprep.subr.bf16.mxu1 %v5149_v44 }
 0x19a   : > { %4635 = vmatmul.mubr.msk.bf16.vlgmr.msra.gmra.mrb[4].mxu0 %vm1585_vm5, %v1623_v48  ;;  %4671 = vmatmul.mubr.msk.bf16.vlgmr.msra.gmra.mrb[4].mxu1 %vm1585_vm5, %v1623_v48 }
 0x19b   : > { %4675 = vmatpush3.bf16.msra.mxu0 %v5148_v43  ;;  %4688 = vmatprep.mubr.msk.bf16.mxu0 %vm1585_vm5, %v2062_v49 }
 0x19c   : > { %4693 = vmatpush3.bf16.msra.mxu1 %v5149_v44  ;;  %4706 = vmatprep.mubr.msk.bf16.mxu1 %vm1585_vm5, %v2062_v49 }
 0x19d   : > { %4676 = vmatprep.subr.bf16.mxu0 %v5150_v50  ;;  %4694 = vmatprep.subr.bf16.mxu1 %v5151_v51 }
 0x19f   : > { %4677 = vmatpush3.bf16.msra.mxu0 %v5150_v50 }
 0x1a0   : > { %4695 = vmatpush3.bf16.msra.mxu1 %v5151_v51  ;;  %4678 = vmatprep.subr.bf16.mxu0 %v5152_v52 }
 0x1a1   : > { %4696 = vmatprep.subr.bf16.mxu1 %v5153_v53 }
 0x1a3   : > { %4679 = vmatpush3.bf16.msra.mxu0 %v5152_v52 }
 0x1a4   : > { %4697 = vmatpush3.bf16.msra.mxu1 %v5153_v53  ;;  %4680 = vmatprep.subr.bf16.mxu0 %v5154_v54 }
 0x1a5   : > { %4698 = vmatprep.subr.bf16.mxu1 %v5155_v55 }
 0x1a7   : > { %4681 = vmatpush3.bf16.msra.mxu0 %v5154_v54 }
 0x1a8   : > { %4699 = vmatpush3.bf16.msra.mxu1 %v5155_v55  ;;  %4682 = vmatprep.subr.bf16.mxu0 %v5156_v56 }
 0x1a9   : > { %4700 = vmatprep.subr.bf16.mxu1 %v5157_v57 }
 0x1ab   : > { %4683 = vmatpush3.bf16.msra.mxu0 %v5156_v56 }
 0x1ac   : > { %4701 = vmatpush3.bf16.msra.mxu1 %v5157_v57  ;;  %4684 = vmatprep.subr.bf16.mxu0 %v5158_v58 }
 0x1ad   : > { %4702 = vmatprep.subr.bf16.mxu1 %v5159_v59 }
 0x1af   : > { %4685 = vmatpush3.bf16.msra.mxu0 %v5158_v58 }
 0x1b0   : > { %4703 = vmatpush3.bf16.msra.mxu1 %v5159_v59  ;;  %4686 = vmatprep.subr.bf16.mxu0 %v5160_v60 }
 0x1b1   : > { %4704 = vmatprep.subr.bf16.mxu1 %v5161_v61 }
 0x1b3   : > { %4687 = vmatpush3.bf16.msra.mxu0 %v5160_v60 }
 0x1b4   : > { %4705 = vmatpush3.bf16.msra.mxu1 %v5161_v61  ;;  %4710 = vmatprep.subr.bf16.mxu0 %v5162_v62 }
 0x1b5   : > { %4728 = vmatprep.subr.bf16.mxu1 %v5163_v0 }
 0x1b6   : > { %4689 = vmatmul.mubr.msk.bf16.vlgmr.msra.gmra.mrb[4].mxu0 %vm1585_vm5, %v2063_v3 }
 0x1b7   : > { %4707 = vmatmul.mubr.msk.bf16.vlgmr.msra.gmra.mrb[4].mxu1 %vm1585_vm5, %v2063_v3  ;;  %4711 = vmatpush3.bf16.msra.mxu0 %v5162_v62 }
 0x1b8   : > { %4724 = vmatprep.mubr.msk.bf16.mxu0 %vm1585_vm5, %v2289_v5  ;;  %4729 = vmatpush3.bf16.msra.mxu1 %v5163_v0 }
 0x1b9   : > { %4742 = vmatprep.mubr.msk.bf16.mxu1 %vm1585_vm5, %v2289_v5  ;;  %4712 = vmatprep.subr.bf16.mxu0 %v5164_v4 }
 0x1ba   : > { %4730 = vmatprep.subr.bf16.mxu1 %v5165_v6 }
 0x1bb   : > { %4713 = vmatpush3.bf16.msra.mxu0 %v5164_v4 }
 0x1bc   : > { %4731 = vmatpush3.bf16.msra.mxu1 %v5165_v6  ;;  %4714 = vmatprep.subr.bf16.mxu0 %v5166_v7 }
 0x1bd   : > { %4732 = vmatprep.subr.bf16.mxu1 %v5167_v8 }
 0x1bf   : > { %4715 = vmatpush3.bf16.msra.mxu0 %v5166_v7 }
 0x1c0   : > { %4733 = vmatpush3.bf16.msra.mxu1 %v5167_v8  ;;  %4716 = vmatprep.subr.bf16.mxu0 %v5168_v9 }
 0x1c1   : > { %4734 = vmatprep.subr.bf16.mxu1 %v5169_v11 }
 0x1c3   : > { %4717 = vmatpush3.bf16.msra.mxu0 %v5168_v9  ;;  %v2777_v9 = vld [vmem:[%s6221_s7] sm:$0x1] }
 0x1c4   : > { %4735 = vmatpush3.bf16.msra.mxu1 %v5169_v11  ;;  %4718 = vmatprep.subr.bf16.mxu0 %v5170_v10  ;;  %v4117_v11 = vld [vmem:[%s6221_s7 + $0x1] sm:$0x1] }
 0x1c5   : > { %4736 = vmatprep.subr.bf16.mxu1 %v5171_v12 }
 0x1c7   : > { %4719 = vmatpush3.bf16.msra.mxu0 %v5170_v10  ;;  %v4135_v10 = vld [vmem:[%s6221_s7 + $0x2] sm:$0x1] }
 0x1c8   : > { %4737 = vmatpush3.bf16.msra.mxu1 %v5171_v12  ;;  %4720 = vmatprep.subr.bf16.mxu0 %v5172_v13  ;;  %v4153_v12 = vld [vmem:[%s6221_s7 + $0x3] sm:$0x1] }
 0x1c9   : > { %4738 = vmatprep.subr.bf16.mxu1 %v5173_v14 }
 0x1cb   : > { %4721 = vmatpush3.bf16.msra.mxu0 %v5172_v13  ;;  %v4171_v13 = vld [vmem:[%s6221_s7 + $0x4] sm:$0x1] }
 0x1cc   : > { %4739 = vmatpush3.bf16.msra.mxu1 %v5173_v14  ;;  %4722 = vmatprep.subr.bf16.mxu0 %v5174_v15  ;;  %v5215_v14 = vld [vmem:[%s6224_s10] sm:$0xff]  }
 0x1cd   : > { %4740 = vmatprep.subr.bf16.mxu1 %v5175_v16 }
 0x1cf   : > { %4723 = vmatpush3.bf16.msra.mxu0 %v5174_v15  ;;  %v5216_v15 = vld [vmem:[%s6224_s10 + $0x8] sm:$0xff]  }
 0x1d0   : > { %4741 = vmatpush3.bf16.msra.mxu1 %v5175_v16  ;;  %4746 = vmatprep.subr.bf16.mxu0 %v5176_v17  ;;  %v5217_v16 = vld [vmem:[%s6224_s10 + $0x10] sm:$0xff]  }
 0x1d1   : > { %4764 = vmatprep.subr.bf16.mxu1 %v5177_v19 }
 0x1d2   : > { %4725 = vmatmul.mubr.msk.bf16.vlgmr.msra.gmra.mrb[4].mxu0 %vm1585_vm5, %v2290_v21 }
 0x1d3   : > { %4743 = vmatmul.mubr.msk.bf16.vlgmr.msra.gmra.mrb[4].mxu1 %vm1585_vm5, %v2290_v21  ;;  %4747 = vmatpush3.bf16.msra.mxu0 %v5176_v17  ;;  %v5218_v17 = vld [vmem:[%s6224_s10 + $0x18] sm:$0xff]   ;;  %v5195_v21 = vld [vmem:[%s6222_s8 + $0x28] sm:$0xff]  }
 0x1d4   : > { %4760 = vmatprep.mubr.msk.bf16.mxu0 %vm1585_vm5, %v2516_v23  ;;  %4765 = vmatpush3.bf16.msra.mxu1 %v5177_v19  ;;  %v5220_v19 = vld [vmem:[%s6224_s10 + $0x28] sm:$0xff]  }
 0x1d5   : > { %4778 = vmatprep.mubr.msk.bf16.mxu1 %vm1585_vm5, %v2516_v23  ;;  %4748 = vmatprep.subr.bf16.mxu0 %v5178_v22 }
 0x1d6   : > { %4766 = vmatprep.subr.bf16.mxu1 %v5179_v24 }
 0x1d7   : > { %4749 = vmatpush3.bf16.msra.mxu0 %v5178_v22 }
 0x1d8   : > { %4767 = vmatpush3.bf16.msra.mxu1 %v5179_v24  ;;  %4750 = vmatprep.subr.bf16.mxu0 %v5180_v25 }
 0x1d9   : > { %4768 = vmatprep.subr.bf16.mxu1 %v5181_v26 }
 0x1db   : > { %4751 = vmatpush3.bf16.msra.mxu0 %v5180_v25 }
 0x1dc   : > { %4769 = vmatpush3.bf16.msra.mxu1 %v5181_v26  ;;  %4752 = vmatprep.subr.bf16.mxu0 %v5182_v27  ;;  %v5196_v26 = vld [vmem:[%s6222_s8 + $0x30] sm:$0xff]  }
 0x1dd   : > { %4770 = vmatprep.subr.bf16.mxu1 %v5183_v28 }
 0x1df   : > { %4753 = vmatpush3.bf16.msra.mxu0 %v5182_v27  ;;  %v5197_v27 = vld [vmem:[%s6222_s8 + $0x38] sm:$0xff]  }
 0x1e0   : > { %4771 = vmatpush3.bf16.msra.mxu1 %v5183_v28  ;;  %4754 = vmatprep.subr.bf16.mxu0 %v5184_v29 }
 0x1e1   : > { %4772 = vmatprep.subr.bf16.mxu1 %v5185_v30 }
 0x1e3   : > { %4755 = vmatpush3.bf16.msra.mxu0 %v5184_v29 }
 0x1e4   : > { %4773 = vmatpush3.bf16.msra.mxu1 %v5185_v30  ;;  %4756 = vmatprep.subr.bf16.mxu0 %v5186_v31 }
 0x1e5   : > { %4774 = vmatprep.subr.bf16.mxu1 %v5187_v32 }
 0x1e7   : > { %4757 = vmatpush3.bf16.msra.mxu0 %v5186_v31 }
 0x1e8   : > { %4775 = vmatpush3.bf16.msra.mxu1 %v5187_v32  ;;  %4758 = vmatprep.subr.bf16.mxu0 %v5188_v33  ;;  %v5198_v32 = vld [vmem:[%s6222_s8 + $0x40] sm:$0xff]  }
 0x1e9   : > { %4776 = vmatprep.subr.bf16.mxu1 %v5189_v34 }
 0x1eb   : > { %4759 = vmatpush3.bf16.msra.mxu0 %v5188_v33  ;;  %v5199_v33 = vld [vmem:[%s6222_s8 + $0x48] sm:$0xff]  }
 0x1ec   : > { %4777 = vmatpush3.bf16.msra.mxu1 %v5189_v34  ;;  %4782 = vmatprep.subr.bf16.mxu0 %v5295_v38 }
 0x1ed   : > { %4790 = vmatprep.subr.bf16.mxu1 %v5295_v38 }
 0x1ee   : > { %4761 = vmatmul.mubr.msk.bf16.vlgmr.msra.gmra.mrb[4].mxu0 %vm1585_vm5, %v2517_v36 }
 0x1ef   : > { %4779 = vmatmul.mubr.msk.bf16.vlgmr.msra.gmra.mrb[4].mxu1 %vm1585_vm5, %v2517_v36  ;;  %4786 = vmatprep.mubr.msk.bf16.mxu0 %vm5296_vm8, %v5295_v38 }
 0x1f0   : > { %4800 = vmatprep.mubr.msk.bf16.mxu1 %vm5296_vm8, %v5295_v38  ;;  %4791 = vmatpush3.bf16.msra.mxu1 %v5190_v37 }
 0x1f1   : > { %4792 = vmatprep.subr.bf16.mxu1 %v5295_v38 }
 0x1f4   : > { %4793 = vmatpush3.bf16.msra.mxu1 %v5191_v39 }
 0x1f5   : > { %4794 = vmatprep.subr.bf16.mxu1 %v5295_v38 }
 0x1f8   : > { %4795 = vmatpush3.bf16.msra.mxu1 %v5192_v40  ;;  %v5200_v40 = vld [vmem:[%s6222_s8 + $0x50] sm:$0xff]  }
 0x1f9   : > { %4796 = vmatprep.subr.bf16.mxu1 %v5295_v38 }
 0x1fc   : > { %4797 = vmatpush3.bf16.msra.mxu1 %v5193_v41  ;;  %v5201_v41 = vld [vmem:[%s6222_s8 + $0x58] sm:$0xff]  }
 0x1fd   : > { %4798 = vmatprep.subr.bf16.mxu1 %v5295_v38 }
 0x200   : > { %4799 = vmatpush3.bf16.msra.mxu1 %v5194_v42 }
 0x201   : > { %4812 = vmatprep.subr.bf16.mxu1 %v5295_v38 }
 0x2c1   : > { %v4762_v43 = vpop.f32.mrb[4].mxu0 }
 0x2c2   : > { %v4780_v44 = vpop.f32.mrb[4].mxu1  ;;  %v2615_v46 = vpop.f32.mrb[5].mxu0 }
 0x2c3   : > { %v2742_v47 = vmax.f32 %v4762_v43, %v4780_v44  ;;  %v2723_v48 = vpop.f32.mrb[5].mxu1  ;;  %v4763_v49 = vpop.f32.mrb[6].mxu0 }
 0x2c4   : > { %v2740_v50 = vmax.f32 %v2615_v46, %v2723_v48  ;;  %v4781_v51 = vpop.f32.mrb[6].mxu1  ;;  %v2618_v52 = vpop.f32.mrb[7].mxu0  ;;  %v5202_v46 = vld [vmem:[%s6222_s8 + $0x60] sm:$0xff]  }
 0x2c5   : > { %v2752_v53 = vadd.f32 %v4109_v45, %v2742_v47  ;;  %v2726_v54 = vpop.f32.mrb[7].mxu1  ;;  %v5203_v47 = vld [vmem:[%s6222_s8 + $0x68] sm:$0xff]  }
 0x2c6   : > { %v2750_v55 = vadd.f32 %v4109_v45, %v2740_v50  ;;  %v2741_v56 = vmax.f32 %v2618_v52, %v2726_v54  ;;  %v5204_v52 = vld [vmem:[%s6222_s8 + $0x70] sm:$0xff]   ;;  %v5205_v54 = vld [vmem:[%s6222_s8 + $0x78] sm:$0xff]  }
 0x2c7   : > { %2761 = vst.msk [vmem:[#allocation4 + $0x10] sm:$0xf] %vm2760_vm9, %v2752_v53 }
 0x2c8   : > { %2758 = vst.msk [vmem:[#allocation4] sm:$0xff] %vm2753_vm7, %v2750_v55  ;;  %v2751_v57 = vadd.f32 %v4109_v45, %v2741_v56  ;;  %v5206_v55 = vld [vmem:[%s6222_s8 + $0x80] sm:$0xff]   ;;  %v5207_v56 = vld [vmem:[%s6222_s8 + $0x88] sm:$0xff]  }
 0x2ca   : > { %2759 = vst.msk [vmem:[#allocation4 + $0x8] sm:$0xff] %vm2753_vm7, %v2751_v57  ;;  %v5208_v57 = vld [vmem:[%s6222_s8 + $0x90] sm:$0xff]  }
 0x2ce   : > { %v2764_v58 = vld [vmem:[#allocation4 + $0x10] sm:$0xf] }
 0x2cf   : > { %v2767_v59 = vld [vmem:[#allocation4 + $0x12] sm:$0xf]  ;;  %v2762_v61 = vld [vmem:[#allocation4] sm:$0xff] }
 0x2d0   : > { %v2770_v60 = vmax.f32 %v2764_v58, %v2767_v59  ;;  %v5209_v58 = vld [vmem:[%s6222_s8 + $0x98] sm:$0xff]  }
 0x2d1   : > { %v2763_v62 = vld [vmem:[#allocation4 + $0x8] sm:$0xff] }
 0x2d2   : > { %v2765_v63 = vld [vmem:[#allocation4 + $0x2] sm:$0xff]  ;;  %v2766_v0 = vld [vmem:[#allocation4 + $0xa] sm:$0xff]  ;;  %v2773_v3 = vmax.f32 %v2770_v60, 0.0 }
 0x2d3   : > { %v2768_v1 = vmax.f32 %v2762_v61, %v2765_v63  ;;  %v2769_v2 = vmax.f32 %v2763_v62, %v2766_v0  ;;  %v5210_v60 = vld [vmem:[%s6222_s8 + $0xa0] sm:$0xff]   ;;  %v5211_v61 = vld [vmem:[%s6222_s8 + $0xa8] sm:$0xff]   ;;  %v5212_v62 = vld [vmem:[%s6222_s8 + $0xb0] sm:$0xff]  }
 0x2d4   : > { %v2775_v7 = vpack.c.bf16 %v2773_v3, %v2773_v3  ;;  %v5213_v63 = vld [vmem:[%s6222_s8 + $0xb8] sm:$0xff]   ;;  %v5214_v0 = vld [vmem:[%s6222_s8 + $0xc0] sm:$0xff]  }
 0x2d5   : > { %v2771_v4 = vmax.f32 %v2768_v1, 0.0  ;;  %v2772_v5 = vmax.f32 %v2769_v2, 0.0  ;;  %v5221_v2 = vld [vmem:[%s6224_s10 + $0x30] sm:$0xff]   ;;  %v5222_v3 = vld [vmem:[%s6224_s10 + $0x38] sm:$0xff]  }
 0x2d6   : > { %v2784_v8 = vsel %vm2782_vm10, %v2775_v7, 0 }
 0x2d7   : > { %v2774_v6 = vpack.c.bf16 %v2772_v5, %v2771_v4  ;;  %v2776_v4 = vld [vmem:[%s6223_s9] sm:$0x1] }
 0x2d9   : > { %4783 = vmatpush3.bf16.msra.mxu0 %v2774_v6 }
 0x2da   : > { %4784 = vmatprep.subr.bf16.mxu0 %v5295_v38 }
 0x2dd   : > { %4785 = vmatpush3.bf16.msra.mxu0 %v2784_v8 }
 0x2de   : > { %4804 = vmatprep.subr.bf16.mxu0 %v5295_v38 }
 0x2e0   : > { %4787 = vmatmul.mubr.msk.bf16.vlgmr.msra.gmra.mrb[8].mxu0 %vm2778_vm11, %v2777_v9 }
 0x2e1   : > { %4805 = vmatpush3.bf16.msra.mxu0 %v2774_v6  ;;  %4808 = vmatprep.mubr.msk.bf16.mxu0 %vm5296_vm8, %v5295_v38 }
 0x2e2   : > { %4806 = vmatprep.subr.bf16.mxu0 %v5295_v38 }
 0x2e5   : > { %4807 = vmatpush3.bf16.msra.mxu0 %v2784_v8 }
 0x2e6   : > { %4826 = vmatprep.subr.bf16.mxu0 %v5295_v38 }
 0x2e8   : > { %4809 = vmatmul.mubr.msk.bf16.vlgmr.msra.gmra.mrb[12].mxu0 %vm2778_vm11, %v4117_v11 }
 0x2e9   : > { %4827 = vmatpush3.bf16.msra.mxu0 %v2774_v6  ;;  %4830 = vmatprep.mubr.msk.bf16.mxu0 %vm5296_vm8, %v5295_v38 }
 0x2ea   : > { %4828 = vmatprep.subr.bf16.mxu0 %v5295_v38 }
 0x2ed   : > { %4829 = vmatpush3.bf16.msra.mxu0 %v2784_v8 }
 0x2ee   : > { %4848 = vmatprep.subr.bf16.mxu0 %v5295_v38 }
 0x2f0   : > { %4831 = vmatmul.mubr.msk.bf16.vlgmr.msra.gmra.mrb[16].mxu0 %vm2778_vm11, %v4135_v10  ;;  %v5223_v10 = vld [vmem:[%s6226_s12] sm:$0xff]  }
 0x2f1   : > { %4849 = vmatpush3.bf16.msra.mxu0 %v2774_v6  ;;  %4852 = vmatprep.mubr.msk.bf16.mxu0 %vm5296_vm8, %v5295_v38 }
 0x2f2   : > { %4850 = vmatprep.subr.bf16.mxu0 %v5295_v38 }
 0x2f5   : > { %4851 = vmatpush3.bf16.msra.mxu0 %v2784_v8 }
 0x2f6   : > { %4870 = vmatprep.subr.bf16.mxu0 %v5295_v38 }
 0x2f8   : > { %4853 = vmatmul.mubr.msk.bf16.vlgmr.msra.gmra.mrb[20].mxu0 %vm2778_vm11, %v4153_v12 }
 0x2f9   : > { %4871 = vmatpush3.bf16.msra.mxu0 %v2774_v6  ;;  %4874 = vmatprep.mubr.msk.bf16.mxu0 %vm5296_vm8, %v5295_v38 }
 0x2fa   : > { %4872 = vmatprep.subr.bf16.mxu0 %v5295_v38 }
 0x2fd   : > { %4873 = vmatpush3.bf16.msra.mxu0 %v2784_v8 }
 0x2fe   : > { %4892 = vmatprep.subr.bf16.mxu0 %v5295_v38 }
 0x300   : > { %4875 = vmatmul.mubr.msk.bf16.vlgmr.msra.gmra.mrb[24].mxu0 %vm2778_vm11, %v4171_v13  ;;  %v5224_v13 = vld [vmem:[%s6226_s12 + $0x8] sm:$0xff]  }
 0x301   : > { %4908 = vmatprep.mubr.msk.bf16.mxu0 %vm5296_vm8, %v5295_v38  ;;  %4893 = vmatpush3.bf16.msra.mxu0 %v5215_v14  ;;  %v5225_v14 = vld [vmem:[%s6226_s12 + $0x10] sm:$0xff]  }
 0x302   : > { %4894 = vmatprep.subr.bf16.mxu0 %v5295_v38 }
 0x305   : > { %4895 = vmatpush3.bf16.msra.mxu0 %v5216_v15  ;;  %v5226_v15 = vld [vmem:[%s6226_s12 + $0x18] sm:$0xff]  }
 0x306   : > { %4896 = vmatprep.subr.bf16.mxu0 %v5295_v38 }
 0x309   : > { %4897 = vmatpush3.bf16.msra.mxu0 %v5217_v16  ;;  %v5227_v16 = vld [vmem:[%s6226_s12 + $0x20] sm:$0xff]  }
 0x30a   : > { %4898 = vmatprep.subr.bf16.mxu0 %v5295_v38 }
 0x30d   : > { %4899 = vmatpush3.bf16.msra.mxu0 %v5218_v17  ;;  %v5228_v17 = vld [vmem:[%s6226_s12 + $0x28] sm:$0xff]  }
 0x30e   : > { %4900 = vmatprep.subr.bf16.mxu0 %v5295_v38 }
 0x311   : > { %4901 = vmatpush3.bf16.msra.mxu0 %v5219_v18  ;;  %v5229_v18 = vld [vmem:[%s6226_s12 + $0x30] sm:$0xff]  }
 0x312   : > { %4902 = vmatprep.subr.bf16.mxu0 %v5295_v38 }
 0x315   : > { %4903 = vmatpush3.bf16.msra.mxu0 %v5220_v19  ;;  %v5230_v19 = vld [vmem:[%s6226_s12 + $0x38] sm:$0xff]  }
 0x316   : > { %4904 = vmatprep.subr.bf16.mxu0 %v5295_v38 }
 0x319   : > { %4905 = vmatpush3.bf16.msra.mxu0 %v5221_v2 }
 0x31a   : > { %4906 = vmatprep.subr.bf16.mxu0 %v5295_v38 }
 0x31d   : > { %4907 = vmatpush3.bf16.msra.mxu0 %v5222_v3 }
 0x31e   : > { %4912 = vmatprep.subr.bf16.mxu0 %v5295_v38 }
 0x3b3   : > { %v2820_v20 = vpop.f32.mrb[8].mxu0 }
 0x3b4   : > { %v2826_v22 = vpack.c.bf16 %v2820_v20, %v2820_v20  ;;  %v4788_v23 = vpop.f32.mrb[9].mxu0  ;;  %v3453_v20 = vld [vmem:[%s6225_s11] sm:$0x1] }
 0x3b5   : > { %v2823_v24 = vpop.f32.mrb[10].mxu0 }
 0x3b6   : > { %v4789_v25 = vpop.f32.mrb[11].mxu0  ;;  %4801 = vmatmul.mubr.msk.bf16.vlgmr.msra.gmra.mrb[8].mxu1 %vm2753_vm7, %v2826_v22 }
 0x3b7   : > { %4813 = vmatpush3.bf16.msra.mxu1 %v5195_v21  ;;  %4822 = vmatprep.mubr.msk.bf16.mxu1 %vm5296_vm8, %v5295_v38 }
 0x3b8   : > { %4814 = vmatprep.subr.bf16.mxu1 %v5295_v38 }
 0x3bb   : > { %4815 = vmatpush3.bf16.msra.mxu1 %v5196_v26  ;;  %v2950_v28 = vpop.f32.mrb[12].mxu0 }
 0x3bc   : > { %4816 = vmatprep.subr.bf16.mxu1 %v5295_v38  ;;  %v4810_v29 = vpop.f32.mrb[13].mxu0  ;;  %v2956_v37 = vpack.c.bf16 %v2950_v28, %v2950_v28 }
 0x3bd   : > { %v2953_v30 = vpop.f32.mrb[14].mxu0 }
 0x3be   : > { %v4811_v31 = vpop.f32.mrb[15].mxu0 }
 0x3bf   : > { %4817 = vmatpush3.bf16.msra.mxu1 %v5197_v27 }
 0x3c0   : > { %4818 = vmatprep.subr.bf16.mxu1 %v5295_v38 }
 0x3c3   : > { %4819 = vmatpush3.bf16.msra.mxu1 %v5198_v32  ;;  %v3081_v34 = vpop.f32.mrb[16].mxu0 }
 0x3c4   : > { %4820 = vmatprep.subr.bf16.mxu1 %v5295_v38  ;;  %v4832_v35 = vpop.f32.mrb[17].mxu0  ;;  %v3087_v53 = vpack.c.bf16 %v3081_v34, %v3081_v34 }
 0x3c5   : > { %v3084_v36 = vpop.f32.mrb[18].mxu0 }
 0x3c6   : > { %v4833_v39 = vpop.f32.mrb[19].mxu0 }
 0x3c7   : > { %4821 = vmatpush3.bf16.msra.mxu1 %v5199_v33 }
 0x3c8   : > { %4834 = vmatprep.subr.bf16.mxu1 %v5295_v38 }
 0x3ca   : > { %4823 = vmatmul.mubr.msk.bf16.vlgmr.msra.gmra.mrb[8].mxu1 %vm2753_vm7, %v2956_v37 }
 0x3cb   : > { %4835 = vmatpush3.bf16.msra.mxu1 %v5200_v40  ;;  %4844 = vmatprep.mubr.msk.bf16.mxu1 %vm5296_vm8, %v5295_v38  ;;  %v3212_v42 = vpop.f32.mrb[20].mxu0 }
 0x3cc   : > { %4836 = vmatprep.subr.bf16.mxu1 %v5295_v38  ;;  %v4854_v43 = vpop.f32.mrb[21].mxu0  ;;  %v3218_v59 = vpack.c.bf16 %v3212_v42, %v3212_v42 }
 0x3cd   : > { %v3215_v44 = vpop.f32.mrb[22].mxu0 }
 0x3ce   : > { %v4855_v45 = vpop.f32.mrb[23].mxu0 }
 0x3cf   : > { %4837 = vmatpush3.bf16.msra.mxu1 %v5201_v41 }
 0x3d0   : > { %4838 = vmatprep.subr.bf16.mxu1 %v5295_v38 }
 0x3d3   : > { %4839 = vmatpush3.bf16.msra.mxu1 %v5202_v46  ;;  %v3343_v48 = vpop.f32.mrb[24].mxu0 }
 0x3d4   : > { %4840 = vmatprep.subr.bf16.mxu1 %v5295_v38  ;;  %v4876_v49 = vpop.f32.mrb[25].mxu0  ;;  %v3349_v1 = vpack.c.bf16 %v3343_v48, %v3343_v48 }
 0x3d5   : > { %v3346_v50 = vpop.f32.mrb[26].mxu0 }
 0x3d6   : > { %v4877_v51 = vpop.f32.mrb[27].mxu0 }
 0x3d7   : > { %4841 = vmatpush3.bf16.msra.mxu1 %v5203_v47 }
 0x3d8   : > { %4842 = vmatprep.subr.bf16.mxu1 %v5295_v38 }
 0x3db   : > { %4843 = vmatpush3.bf16.msra.mxu1 %v5204_v52 }
 0x3dc   : > { %4856 = vmatprep.subr.bf16.mxu1 %v5295_v38 }
 0x3de   : > { %4845 = vmatmul.mubr.msk.bf16.vlgmr.msra.gmra.mrb[8].mxu1 %vm2753_vm7, %v3087_v53 }
 0x3df   : > { %4857 = vmatpush3.bf16.msra.mxu1 %v5205_v54  ;;  %4866 = vmatprep.mubr.msk.bf16.mxu1 %vm5296_vm8, %v5295_v38 }
 0x3e0   : > { %4858 = vmatprep.subr.bf16.mxu1 %v5295_v38 }
 0x3e3   : > { %4859 = vmatpush3.bf16.msra.mxu1 %v5206_v55 }
 0x3e4   : > { %4860 = vmatprep.subr.bf16.mxu1 %v5295_v38 }
 0x3e7   : > { %4861 = vmatpush3.bf16.msra.mxu1 %v5207_v56 }
 0x3e8   : > { %4862 = vmatprep.subr.bf16.mxu1 %v5295_v38 }
 0x3eb   : > { %4863 = vmatpush3.bf16.msra.mxu1 %v5208_v57 }
 0x3ec   : > { %4864 = vmatprep.subr.bf16.mxu1 %v5295_v38 }
 0x3ef   : > { %4865 = vmatpush3.bf16.msra.mxu1 %v5209_v58 }
 0x3f0   : > { %4878 = vmatprep.subr.bf16.mxu1 %v5295_v38 }
 0x3f2   : > { %4867 = vmatmul.mubr.msk.bf16.vlgmr.msra.gmra.mrb[8].mxu1 %vm2753_vm7, %v3218_v59 }
 0x3f3   : > { %4879 = vmatpush3.bf16.msra.mxu1 %v5210_v60  ;;  %4888 = vmatprep.mubr.msk.bf16.mxu1 %vm5296_vm8, %v5295_v38 }
 0x3f4   : > { %4880 = vmatprep.subr.bf16.mxu1 %v5295_v38 }
 0x3f7   : > { %4881 = vmatpush3.bf16.msra.mxu1 %v5211_v61 }
 0x3f8   : > { %4882 = vmatprep.subr.bf16.mxu1 %v5295_v38 }
 0x3fb   : > { %4883 = vmatpush3.bf16.msra.mxu1 %v5212_v62 }
 0x3fc   : > { %4884 = vmatprep.subr.bf16.mxu1 %v5295_v38 }
 0x3ff   : > { %4885 = vmatpush3.bf16.msra.mxu1 %v5213_v63 }
 0x400   : > { %4886 = vmatprep.subr.bf16.mxu1 %v5295_v38 }
 0x403   : > { %4887 = vmatpush3.bf16.msra.mxu1 %v5214_v0 }
 0x406   : > { %4889 = vmatmul.mubr.msk.bf16.vlgmr.msra.gmra.mrb[8].mxu1 %vm2753_vm7, %v3349_v1 }
 0x4d9   : > { %v3428_v5 = vpop.f32.mrb[8].mxu1 }
 0x4da   : > { %v4932_v6 = vadd.f32 %v3428_v5, %v2776_v4  ;;  %v4890_v7 = vpop.f32.mrb[9].mxu1 }
 0x4db   : > { %v3431_v8 = vpop.f32.mrb[10].mxu1 }
 0x4dc   : > { %v3435_v9 = vmax.f32 %v4932_v6, 0.0  ;;  %v4891_v11 = vpop.f32.mrb[11].mxu1 }
 0x4de   : > { %v3436_v12 = vpack.c.bf16 %v3435_v9, %v3435_v9 }
 0x4e0   : > { %4909 = vmatmul.mubr.bf16.vlgmr.msra.gmra.mrb[28].mxu0 %v3436_v12 }
 0x4e1   : > { %4913 = vmatpush3.bf16.msra.mxu0 %v5223_v10  ;;  %4928 = vmatprep.mubr.msk.bf16.mxu0 %vm5296_vm8, %v5295_v38 }
 0x4e2   : > { %4914 = vmatprep.subr.bf16.mxu0 %v5295_v38 }
 0x4e5   : > { %4915 = vmatpush3.bf16.msra.mxu0 %v5224_v13 }
 0x4e6   : > { %4916 = vmatprep.subr.bf16.mxu0 %v5295_v38 }
 0x4e9   : > { %4917 = vmatpush3.bf16.msra.mxu0 %v5225_v14 }
 0x4ea   : > { %4918 = vmatprep.subr.bf16.mxu0 %v5295_v38 }
 0x4ed   : > { %4919 = vmatpush3.bf16.msra.mxu0 %v5226_v15 }
 0x4ee   : > { %4920 = vmatprep.subr.bf16.mxu0 %v5295_v38 }
 0x4f1   : > { %4921 = vmatpush3.bf16.msra.mxu0 %v5227_v16 }
 0x4f2   : > { %4922 = vmatprep.subr.bf16.mxu0 %v5295_v38 }
 0x4f5   : > { %4923 = vmatpush3.bf16.msra.mxu0 %v5228_v17 }
 0x4f6   : > { %4924 = vmatprep.subr.bf16.mxu0 %v5295_v38 }
 0x4f9   : > { %4925 = vmatpush3.bf16.msra.mxu0 %v5229_v18 }
 0x4fa   : > { %4926 = vmatprep.subr.bf16.mxu0 %v5295_v38  ;;  %v3560_v38 = vld [vmem:[%s6227_s13] sm:$0x1] }
 0x4fd   : > { %4927 = vmatpush3.bf16.msra.mxu0 %v5230_v19 }
 0x5b3   : > { %v3536_v21 = vpop.f32.mrb[28].mxu0 }
 0x5b4   : > { %v3537_v22 = vadd.f32 %v3536_v21, %v3453_v20  ;;  %v4910_v23 = vpop.f32.mrb[29].mxu0 }
 0x5b5   : > { %v3539_v24 = vpop.f32.mrb[30].mxu0 }
 0x5b6   : > { %v3542_v25 = vmax.f32 %v3537_v22, 0.0  ;;  %v4911_v26 = vpop.f32.mrb[31].mxu0 }
 0x5b8   : > { %v3543_v27 = vpack.c.bf16 %v3542_v25, %v3542_v25 }
 0x5ba   : > { %4929 = vmatmul.mubr.bf16.vlgmr.msra.gmra.mrb[32].mxu0 %v3543_v27 }
 0x68d   : > { %v3643_v28 = vpop.f32.mrb[32].mxu0 }
 0x68e   : > { %v3644_v29 = vadd.f32 %v3643_v28, %v3560_v38  ;;  %v4930_v30 = vpop.f32.mrb[33].mxu0 }
 0x68f   : > { %v3646_v31 = vpop.f32.mrb[34].mxu0 }
 0x690   : > { %3649 = vst [vmem:[%s459_s27] sm:$0x1] %v3644_v29  ;;  %v4931_v32 = vpop.f32.mrb[35].mxu0 }
 0x691   : > { %5244 = shalt.err (!%p5241_p3)
}
 0x692   : > { %s5245_s25 = scalar_lea.hbm %s6172_s20, 16  ;;  %s5249_s28 = scalar_lea.hbm %s6228_s14, 32 }
 0x693   : > { %p5246_p4 = scmp.ne.s32.totalorder %s6172_s20, %s5245_s25  ;;  %p5250_p9 = scmp.lt.u32.totalorder %s6172_s20, %s6228_s14 }
 0x694   : > { %p5251_p10 = scmp.lt.u32.totalorder %s5249_s28, %s5245_s25  ;;  %p5253_p12 = scmp.lt.u32.totalorder %s5245_s25, %s6172_s20 }
 0x695   : > { %p5247_p7 = pnand %p5246_p4, %p5411_p5 }
 0x696   : > { %p5252_p11 = por %p5251_p10, %p5250_p9 }
 0x697   : > { %p5248_p8 = pneg %p5247_p7 }
 0x698   : > { %p5254_p13 = por %p5253_p12, %p5252_p11 }
 0x69a   : > { %p5255_p0 = pnand %p5254_p13, %p5248_p8 }
 0x69c   : > { %5258 = shalt.err (!%p5255_p0)
}
 0x69d   : > { %5013 = dma.vmem_to_hbm [thread:$0]  (%p5411_p5), %s6174_s19, 16, %s6172_s20, %s3651_s15  }
 0x69e PF: > { %p5019_p1 = scmp.ge.s32.totalorder %s5293_s16, 2  ;;  %s3675_s26 = sand.u32 1, %s5281_s29  }
 0x69f   : > { %s3676_s24 = scalar_lea.sflag [#allocation6], %s3675_s26 }
 0x6a0   : > { %p5016_p2 = pnand %p5019_p1, %p5415_p6 }
 0x6a2   : > { %5276 = dma.done.wait (!%p5016_p2), %s3676_s24, 16  }
 0x6a3   : > { %5278 = vsyncadd (!%p5016_p2), %s3676_s24, 4294967280  ;;  %s6240_s16 = sld [smem:[#allocation9_spill]]  ;;  %s6241_s25 = sld [smem:[#allocation8_spill]] }
 0x6a4   : > { %s6242_s15 = sld [smem:[#allocation10_spill]]  ;;  %s6243_s29 = smov %s5285_s30 }
 0x6a9   : > { %p24_p3 = scmp.ge.s32.totalorder %s6240_s16, 4   ;;  %s6244_s30 = smov %s6241_s25 }
 0x6ab   :  { %26 = sbr.rel (!%p24_p3) target bundleno = 3 (0x3), region = 135 }
 0x6b2   :  { %3680 = vsyncpa [#allocation6], 1 }
 0x6b3   :  { %3682 = vsyncpa [#allocation6 + $0x1], 1 }

</bundles_post_ra>
